<compile_context>
chip_gen: v7x
topology: tpu7x:2x2x1
jax: 0.10.0
libtpu: 0.0.40
codegen_flags: <defaults>
</compile_context>

<pallas_src>
import jax
import jax.numpy as jnp
from jax.experimental import pallas as pl
from jax.experimental.pallas import tpu as pltpu

IN_FEATURES = 8          # GCNConv(8, hidden) in the reference module
HIDDEN = 32              # hidden_channels
NUM_CLASSES = 4          # num_classes
N_NODES = 16             # number of graph nodes in one toy batch
N_GRAPHS = 2             # number of graphs per batch (global_mean_pool groups)
G_BATCH = 4              # independent graph batches processed along the grid axis

LANE = 128               # lane-dense padded feature / node width (TPU lane count)
P_ROWS = 16              # pooling-matrix rows padded to a bf16 sublane-pair multiple
OUT_ROWS = 16            # output rows padded (f32, lane-dense store)
BIAS_ROWS = 8            # bias slab rows (f32 tile)
NUM_LAYERS = 6           # 5 GCN convs + final linear
DATA_ROWS = 2 * LANE + P_ROWS   # A [128] + X [128] + P [16] = 272 rows


def gcn_kernel(data_ref, w_ref, b_ref, out_ref):
    """Fused forward pass for ONE graph batch (one grid step).

    data slab rows (bf16, [272, 128]):
      [0   : 128)  normalized adjacency A  (valid corner [N_NODES, N_NODES])
      [128 : 256)  node features X         (valid corner [N_NODES, IN_FEATURES])
      [256 : 272)  mean-pool matrix P      (valid corner [N_GRAPHS, N_NODES])
    w slab (bf16, [6, 128, 128]):  w1..w5, wo zero-padded into 128x128 tiles
    b slab (f32,  [8, 128]):       rows 0..4 = b1..b5, row 5 = bo, zero-padded
    """
    a = data_ref[0:LANE, :]                        # [128, 128] bf16
    x = data_ref[LANE:2 * LANE, :]                 # [128, 128] bf16
    p = data_ref[2 * LANE:2 * LANE + P_ROWS, :]    # [16, 128]  bf16

    # --- layer 1: aggregate then project ---
    ax = jnp.dot(a, x, preferred_element_type=jnp.float32)            # [128, 128] f32
    h = jnp.dot(ax.astype(jnp.bfloat16), w_ref[0],
                preferred_element_type=jnp.float32)                    # [128, 128] f32
    h = jnp.maximum(h + b_ref[0:1, :], 0.0)

    # --- layers 2..5: project, aggregate, bias, ReLU (f32 epilogue) ---
    for i in range(1, 5):
        t = jnp.dot(h.astype(jnp.bfloat16), w_ref[i],
                    preferred_element_type=jnp.float32)
        t = jnp.dot(a, t.astype(jnp.bfloat16),
                    preferred_element_type=jnp.float32)
        h = jnp.maximum(t + b_ref[i:i + 1, :], 0.0)

    # --- global_mean_pool (matmul with P) + final Linear ---
    pooled = jnp.dot(p, h.astype(jnp.bfloat16),
                     preferred_element_type=jnp.float32)               # [16, 128]
    logits = jnp.dot(pooled.astype(jnp.bfloat16), w_ref[5],
                     preferred_element_type=jnp.float32)
    logits = logits + b_ref[5:6, :]                                    # [16, 128] f32

    # --- log_softmax over the NUM_CLASSES valid lanes (padded lanes masked, f32) ---
    lane_idx = jax.lax.broadcasted_iota(jnp.int32, logits.shape, 1)
    masked = jnp.where(lane_idx < NUM_CLASSES, logits, -1e30)
    m = jnp.max(masked, axis=1, keepdims=True)
    shifted = masked - m
    lse = jnp.log(jnp.sum(jnp.exp(shifted), axis=1, keepdims=True))
    out_ref[...] = shifted - lse


def pack_params(params):
    """Pack all weights/biases into constant slabs ONCE (hoisted out of the call path)."""
    (w1, b1, w2, b2, w3, b3, w4, b4, w5, b5, wo, bo) = params

    w_slab = jnp.zeros((NUM_LAYERS, LANE, LANE), jnp.float32)
    w_slab = w_slab.at[0, :IN_FEATURES, :HIDDEN].set(w1)
    for i, w in enumerate((w2, w3, w4, w5)):
        w_slab = w_slab.at[i + 1, :HIDDEN, :HIDDEN].set(w)
    w_slab = w_slab.at[5, :HIDDEN, :NUM_CLASSES].set(wo)

    b_slab = jnp.zeros((BIAS_ROWS, LANE), jnp.float32)
    for i, b in enumerate((b1, b2, b3, b4, b5)):
        b_slab = b_slab.at[i, :HIDDEN].set(b.reshape(-1))
    b_slab = b_slab.at[5, :NUM_CLASSES].set(bo.reshape(-1))

    return w_slab.astype(jnp.bfloat16), b_slab     # weights bf16, biases f32


def pack_data(a_hat, x, pool_mat):
    """Pack batched per-call operands into one lane-dense bf16 slab [G, 272, 128]."""
    a_pad = jnp.pad(a_hat, ((0, 0), (0, LANE - N_NODES), (0, LANE - N_NODES)))
    x_pad = jnp.pad(x, ((0, 0), (0, LANE - N_NODES), (0, LANE - IN_FEATURES)))
    p_pad = jnp.pad(pool_mat, ((0, 0), (0, P_ROWS - N_GRAPHS), (0, LANE - N_NODES)))
    return jnp.concatenate([a_pad, x_pad, p_pad], axis=1).astype(jnp.bfloat16)


@jax.jit
def gcn_forward(a_hat, x, pool_mat, w_slab, b_slab):
    """a_hat [G,N,N], x [G,N,F], pool_mat [G,B,N]; w_slab/b_slab are pre-packed."""
    data = pack_data(a_hat, x, pool_mat)           # [G, 272, 128] bf16
    g_batch = data.shape[0]

    grid_spec = pltpu.PrefetchScalarGridSpec(
        num_scalar_prefetch=0,
        grid=(g_batch,),
        in_specs=[
            # per-batch data slab
            pl.BlockSpec((None, DATA_ROWS, LANE), lambda g: (g, 0, 0)),
            # weights/biases: constant block index -> fetched once, VMEM-resident
            pl.BlockSpec((NUM_LAYERS, LANE, LANE), lambda g: (0, 0, 0)),
            pl.BlockSpec((BIAS_ROWS, LANE), lambda g: (0, 0)),
        ],
        out_specs=pl.BlockSpec((None, OUT_ROWS, LANE), lambda g: (g, 0, 0)),
    )

    out_padded = pl.pallas_call(
        gcn_kernel,
        out_shape=jax.ShapeDtypeStruct((g_batch, OUT_ROWS, LANE), jnp.float32),
        grid_spec=grid_spec,
        compiler_params=pltpu.CompilerParams(dimension_semantics=("parallel",)),
    )(data, w_slab, b_slab)

    return out_padded[:, :N_GRAPHS, :NUM_CLASSES]


def build_normalized_adjacency(edge_index, num_nodes):
    """A_hat = D^{-1/2} (A + I) D^{-1/2}, matching PyG GCNConv defaults.

    Uses scatter-add so duplicate edges accumulate like PyG's scatter-add.
    """
    src, dst = edge_index
    adj = jnp.zeros((num_nodes, num_nodes), jnp.float32)
    adj = adj.at[dst, src].add(1.0)                 # message flows source -> target
    adj = adj + jnp.eye(num_nodes, dtype=jnp.float32)   # self loops
    deg = jnp.sum(adj, axis=1)
    dinv = jnp.where(deg > 0, 1.0 / jnp.sqrt(deg), 0.0)
    return dinv[:, None] * adj * dinv[None, :]


def build_pool_matrix(batch, num_graphs, num_nodes):
    """P[b, i] = 1/count_b if batch[i] == b else 0  (global_mean_pool)."""
    onehot = (batch[None, :] == jnp.arange(num_graphs)[:, None]).astype(jnp.float32)
    counts = jnp.maximum(jnp.sum(onehot, axis=1, keepdims=True), 1.0)
    return onehot / counts


def init_params(key):
    """Deterministic glorot-ish init for all layer weights/biases (f32 master copy)."""
    dims = [(IN_FEATURES, HIDDEN)] + [(HIDDEN, HIDDEN)] * 4
    params = []
    keys = jax.random.split(key, 6)
    for k, (fi, fo) in zip(keys[:5], dims):
        scale = (6.0 / (fi + fo)) ** 0.5
        w = jax.random.uniform(k, (fi, fo), jnp.float32, -scale, scale)
        b = jnp.zeros((1, fo), jnp.float32)
        params.extend([w, b])
    scale = (6.0 / (HIDDEN + NUM_CLASSES)) ** 0.5
    wo = jax.random.uniform(keys[5], (HIDDEN, NUM_CLASSES), jnp.float32, -scale, scale)
    bo = jnp.zeros((1, NUM_CLASSES), jnp.float32)
    params.extend([wo, bo])
    return tuple(params)


def reference_forward(a_hat, x, params, pool_mat):
    """Pure-jnp reference (original f32 PyTorch semantics) for one graph batch."""
    (w1, b1, w2, b2, w3, b3, w4, b4, w5, b5, wo, bo) = params
    for w, b in ((w1, b1), (w2, b2), (w3, b3), (w4, b4), (w5, b5)):
        x = jnp.maximum(a_hat @ (x @ w) + b, 0.0)
    logits = pool_mat @ x @ wo + bo
    return jax.nn.log_softmax(logits, axis=1)


def _bf16_round(t):
    return t.astype(jnp.bfloat16).astype(jnp.float32)


if __name__ == "__main__":
    key = jax.random.PRNGKey(0)
    k_params, k_data = jax.random.split(key)

    params = init_params(k_params)
    w_slab, b_slab = pack_params(params)            # packed ONCE, reused every call

    # Build G_BATCH independent graph batches (different features / edges each).
    a_list, x_list, p_list = [], [], []
    for g in range(G_BATCH):
        kg = jax.random.fold_in(k_data, g)
        k_feat, k_edge = jax.random.split(kg)
        xg = jax.random.normal(k_feat, (N_NODES, IN_FEATURES), jnp.float32)
        n_edges = 24
        src = jax.random.randint(k_edge, (n_edges,), 0, N_NODES)
        dst = jax.random.randint(jax.random.fold_in(k_edge, 1), (n_edges,), 0, N_NODES)
        edge_index = jnp.stack([jnp.concatenate([src, dst]),
                                jnp.concatenate([dst, src])]).astype(jnp.int32)
        batch = jnp.concatenate([jnp.zeros(N_NODES // 2, jnp.int32),
                                 jnp.ones(N_NODES - N_NODES // 2, jnp.int32)])
        a_list.append(build_normalized_adjacency(edge_index, N_NODES))
        x_list.append(xg)
        p_list.append(build_pool_matrix(batch, N_GRAPHS, N_NODES))

    a_hat = jnp.stack(a_list)          # [G, N, N]
    x = jnp.stack(x_list)              # [G, N, F]
    pool_mat = jnp.stack(p_list)       # [G, B, N]

    out = gcn_forward(a_hat, x, pool_mat, w_slab, b_slab)
    out = jax.block_until_ready(out)

    # Reference: PyTorch-semantics f32 math, evaluated at the bf16-rounded operands the
    # kernel actually consumes (mixed-precision tolerance for the remaining intermediate
    # bf16 casts on the MXU path).
    params_r = tuple(_bf16_round(p) for p in params)
    ref = jnp.stack([
        reference_forward(_bf16_round(a_hat[g]), _bf16_round(x[g]),
                          params_r, _bf16_round(pool_mat[g]))
        for g in range(G_BATCH)
    ])

    assert out.shape == (G_BATCH, N_GRAPHS, NUM_CLASSES)
    assert jnp.allclose(out, ref, atol=5e-2, rtol=5e-2), "mismatch vs jnp reference"

    print("KERNEL_OK")
</pallas_src>

<mosaic_0001>
module attributes {stable_mosaic.version = 11 : i64} {
  func.func @gcn_kernel(%arg0: i32, %arg1: memref<1x272x128xbf16, #tpu.memory_space<vmem>>, %arg2: memref<6x128x128xbf16, #tpu.memory_space<vmem>>, %arg3: memref<8x128xf32, #tpu.memory_space<vmem>>, %arg4: memref<1x16x128xf32, #tpu.memory_space<vmem>>) attributes {dimension_semantics = [#tpu.dimension_semantics<parallel>], iteration_bounds = array<i64: 4>, scalar_prefetch = 0 : i64, scratch_operands = 0 : i64, tpu.core_type = #tpu.core_type<tc>, window_params = [{transform_indices = @transform_0, window_bounds = array<i64: 1, 272, 128>}, {pipeline_mode = #tpu.pipeline_mode<synchronous>, transform_indices = @transform_1, window_bounds = array<i64: 6, 128, 128>}, {pipeline_mode = #tpu.pipeline_mode<synchronous>, transform_indices = @transform_2, window_bounds = array<i64: 8, 128>}, {transform_indices = @transform_3, window_bounds = array<i64: 1, 16, 128>}]} {
    %c0 = arith.constant 0 : index
    %c0_0 = arith.constant 0 : index
    %c0_1 = arith.constant 0 : index
    %0 = vector.load %arg1[%c0, %c0_0, %c0_1] : memref<1x272x128xbf16, #tpu.memory_space<vmem>>, vector<1x128x128xbf16>
    %1 = vector.shape_cast %0 : vector<1x128x128xbf16> to vector<128x128xbf16>
    %c0_2 = arith.constant 0 : index
    %c128 = arith.constant 128 : index
    %c0_3 = arith.constant 0 : index
    %2 = vector.load %arg1[%c0_2, %c128, %c0_3] : memref<1x272x128xbf16, #tpu.memory_space<vmem>>, vector<1x128x128xbf16>
    %3 = vector.shape_cast %2 : vector<1x128x128xbf16> to vector<128x128xbf16>
    %c0_4 = arith.constant 0 : index
    %c256 = arith.constant 256 : index
    %c0_5 = arith.constant 0 : index
    %4 = vector.load %arg1[%c0_4, %c256, %c0_5] : memref<1x272x128xbf16, #tpu.memory_space<vmem>>, vector<1x16x128xbf16>
    %5 = vector.shape_cast %4 : vector<1x16x128xbf16> to vector<16x128xbf16>
    %cst = arith.constant dense<0.000000e+00> : vector<128x128xf32>
    %6 = tpu.matmul %1, %3, %cst {dimension_numbers = #tpu.dot_dimension_numbers<[1], [0], [0], [1], [0, 0, 1, 1], [], []>} : vector<128x128xbf16>, vector<128x128xbf16>, vector<128x128xf32> -> vector<128x128xf32>
    %7 = arith.truncf %6 : vector<128x128xf32> to vector<128x128xbf16>
    %c0_6 = arith.constant 0 : index
    %c0_7 = arith.constant 0 : index
    %c0_8 = arith.constant 0 : index
    %8 = vector.load %arg2[%c0_6, %c0_7, %c0_8] : memref<6x128x128xbf16, #tpu.memory_space<vmem>>, vector<1x128x128xbf16>
    %9 = vector.shape_cast %8 : vector<1x128x128xbf16> to vector<128x128xbf16>
    %cst_9 = arith.constant dense<0.000000e+00> : vector<128x128xf32>
    %10 = tpu.matmul %7, %9, %cst_9 {dimension_numbers = #tpu.dot_dimension_numbers<[1], [0], [0], [1], [0, 0, 1, 1], [], []>} : vector<128x128xbf16>, vector<128x128xbf16>, vector<128x128xf32> -> vector<128x128xf32>
    %c0_10 = arith.constant 0 : index
    %c0_11 = arith.constant 0 : index
    %11 = vector.load %arg3[%c0_10, %c0_11] : memref<8x128xf32, #tpu.memory_space<vmem>>, vector<1x128xf32>
    %12 = vector.broadcast %11 : vector<1x128xf32> to vector<128x128xf32>
    %13 = arith.addf %10, %12 : vector<128x128xf32>
    %cst_12 = arith.constant 0.000000e+00 : f32
    %14 = vector.broadcast %cst_12 : f32 to vector<128x128xf32>
    %15 = arith.maximumf %13, %14 : vector<128x128xf32>
    %16 = arith.truncf %15 : vector<128x128xf32> to vector<128x128xbf16>
    %c1 = arith.constant 1 : index
    %c0_13 = arith.constant 0 : index
    %c0_14 = arith.constant 0 : index
    %17 = vector.load %arg2[%c1, %c0_13, %c0_14] : memref<6x128x128xbf16, #tpu.memory_space<vmem>>, vector<1x128x128xbf16>
    %18 = vector.shape_cast %17 : vector<1x128x128xbf16> to vector<128x128xbf16>
    %cst_15 = arith.constant dense<0.000000e+00> : vector<128x128xf32>
    %19 = tpu.matmul %16, %18, %cst_15 {dimension_numbers = #tpu.dot_dimension_numbers<[1], [0], [0], [1], [0, 0, 1, 1], [], []>} : vector<128x128xbf16>, vector<128x128xbf16>, vector<128x128xf32> -> vector<128x128xf32>
    %20 = arith.truncf %19 : vector<128x128xf32> to vector<128x128xbf16>
    %cst_16 = arith.constant dense<0.000000e+00> : vector<128x128xf32>
    %21 = tpu.matmul %1, %20, %cst_16 {dimension_numbers = #tpu.dot_dimension_numbers<[1], [0], [0], [1], [0, 0, 1, 1], [], []>} : vector<128x128xbf16>, vector<128x128xbf16>, vector<128x128xf32> -> vector<128x128xf32>
    %c1_17 = arith.constant 1 : index
    %c0_18 = arith.constant 0 : index
    %22 = vector.load %arg3[%c1_17, %c0_18] : memref<8x128xf32, #tpu.memory_space<vmem>>, vector<1x128xf32>
    %23 = vector.broadcast %22 : vector<1x128xf32> to vector<128x128xf32>
    %24 = arith.addf %21, %23 : vector<128x128xf32>
    %cst_19 = arith.constant 0.000000e+00 : f32
    %25 = vector.broadcast %cst_19 : f32 to vector<128x128xf32>
    %26 = arith.maximumf %24, %25 : vector<128x128xf32>
    %27 = arith.truncf %26 : vector<128x128xf32> to vector<128x128xbf16>
    %c2 = arith.constant 2 : index
    %c0_20 = arith.constant 0 : index
    %c0_21 = arith.constant 0 : index
    %28 = vector.load %arg2[%c2, %c0_20, %c0_21] : memref<6x128x128xbf16, #tpu.memory_space<vmem>>, vector<1x128x128xbf16>
    %29 = vector.shape_cast %28 : vector<1x128x128xbf16> to vector<128x128xbf16>
    %cst_22 = arith.constant dense<0.000000e+00> : vector<128x128xf32>
    %30 = tpu.matmul %27, %29, %cst_22 {dimension_numbers = #tpu.dot_dimension_numbers<[1], [0], [0], [1], [0, 0, 1, 1], [], []>} : vector<128x128xbf16>, vector<128x128xbf16>, vector<128x128xf32> -> vector<128x128xf32>
    %31 = arith.truncf %30 : vector<128x128xf32> to vector<128x128xbf16>
    %cst_23 = arith.constant dense<0.000000e+00> : vector<128x128xf32>
    %32 = tpu.matmul %1, %31, %cst_23 {dimension_numbers = #tpu.dot_dimension_numbers<[1], [0], [0], [1], [0, 0, 1, 1], [], []>} : vector<128x128xbf16>, vector<128x128xbf16>, vector<128x128xf32> -> vector<128x128xf32>
    %c2_24 = arith.constant 2 : index
    %c0_25 = arith.constant 0 : index
    %33 = vector.load %arg3[%c2_24, %c0_25] : memref<8x128xf32, #tpu.memory_space<vmem>>, vector<1x128xf32>
    %34 = vector.broadcast %33 : vector<1x128xf32> to vector<128x128xf32>
    %35 = arith.addf %32, %34 : vector<128x128xf32>
    %cst_26 = arith.constant 0.000000e+00 : f32
    %36 = vector.broadcast %cst_26 : f32 to vector<128x128xf32>
    %37 = arith.maximumf %35, %36 : vector<128x128xf32>
    %38 = arith.truncf %37 : vector<128x128xf32> to vector<128x128xbf16>
    %c3 = arith.constant 3 : index
    %c0_27 = arith.constant 0 : index
    %c0_28 = arith.constant 0 : index
    %39 = vector.load %arg2[%c3, %c0_27, %c0_28] : memref<6x128x128xbf16, #tpu.memory_space<vmem>>, vector<1x128x128xbf16>
    %40 = vector.shape_cast %39 : vector<1x128x128xbf16> to vector<128x128xbf16>
    %cst_29 = arith.constant dense<0.000000e+00> : vector<128x128xf32>
    %41 = tpu.matmul %38, %40, %cst_29 {dimension_numbers = #tpu.dot_dimension_numbers<[1], [0], [0], [1], [0, 0, 1, 1], [], []>} : vector<128x128xbf16>, vector<128x128xbf16>, vector<128x128xf32> -> vector<128x128xf32>
    %42 = arith.truncf %41 : vector<128x128xf32> to vector<128x128xbf16>
    %cst_30 = arith.constant dense<0.000000e+00> : vector<128x128xf32>
    %43 = tpu.matmul %1, %42, %cst_30 {dimension_numbers = #tpu.dot_dimension_numbers<[1], [0], [0], [1], [0, 0, 1, 1], [], []>} : vector<128x128xbf16>, vector<128x128xbf16>, vector<128x128xf32> -> vector<128x128xf32>
    %c3_31 = arith.constant 3 : index
    %c0_32 = arith.constant 0 : index
    %44 = vector.load %arg3[%c3_31, %c0_32] : memref<8x128xf32, #tpu.memory_space<vmem>>, vector<1x128xf32>
    %45 = vector.broadcast %44 : vector<1x128xf32> to vector<128x128xf32>
    %46 = arith.addf %43, %45 : vector<128x128xf32>
    %cst_33 = arith.constant 0.000000e+00 : f32
    %47 = vector.broadcast %cst_33 : f32 to vector<128x128xf32>
    %48 = arith.maximumf %46, %47 : vector<128x128xf32>
    %49 = arith.truncf %48 : vector<128x128xf32> to vector<128x128xbf16>
    %c4 = arith.constant 4 : index
    %c0_34 = arith.constant 0 : index
    %c0_35 = arith.constant 0 : index
    %50 = vector.load %arg2[%c4, %c0_34, %c0_35] : memref<6x128x128xbf16, #tpu.memory_space<vmem>>, vector<1x128x128xbf16>
    %51 = vector.shape_cast %50 : vector<1x128x128xbf16> to vector<128x128xbf16>
    %cst_36 = arith.constant dense<0.000000e+00> : vector<128x128xf32>
    %52 = tpu.matmul %49, %51, %cst_36 {dimension_numbers = #tpu.dot_dimension_numbers<[1], [0], [0], [1], [0, 0, 1, 1], [], []>} : vector<128x128xbf16>, vector<128x128xbf16>, vector<128x128xf32> -> vector<128x128xf32>
    %53 = arith.truncf %52 : vector<128x128xf32> to vector<128x128xbf16>
    %cst_37 = arith.constant dense<0.000000e+00> : vector<128x128xf32>
    %54 = tpu.matmul %1, %53, %cst_37 {dimension_numbers = #tpu.dot_dimension_numbers<[1], [0], [0], [1], [0, 0, 1, 1], [], []>} : vector<128x128xbf16>, vector<128x128xbf16>, vector<128x128xf32> -> vector<128x128xf32>
    %c4_38 = arith.constant 4 : index
    %c0_39 = arith.constant 0 : index
    %55 = vector.load %arg3[%c4_38, %c0_39] : memref<8x128xf32, #tpu.memory_space<vmem>>, vector<1x128xf32>
    %56 = vector.broadcast %55 : vector<1x128xf32> to vector<128x128xf32>
    %57 = arith.addf %54, %56 : vector<128x128xf32>
    %cst_40 = arith.constant 0.000000e+00 : f32
    %58 = vector.broadcast %cst_40 : f32 to vector<128x128xf32>
    %59 = arith.maximumf %57, %58 : vector<128x128xf32>
    %60 = arith.truncf %59 : vector<128x128xf32> to vector<128x128xbf16>
    %cst_41 = arith.constant dense<0.000000e+00> : vector<16x128xf32>
    %61 = tpu.matmul %5, %60, %cst_41 {dimension_numbers = #tpu.dot_dimension_numbers<[1], [0], [0], [1], [0, 0, 1, 1], [], []>} : vector<16x128xbf16>, vector<128x128xbf16>, vector<16x128xf32> -> vector<16x128xf32>
    %62 = arith.truncf %61 : vector<16x128xf32> to vector<16x128xbf16>
    %c5 = arith.constant 5 : index
    %c0_42 = arith.constant 0 : index
    %c0_43 = arith.constant 0 : index
    %63 = vector.load %arg2[%c5, %c0_42, %c0_43] : memref<6x128x128xbf16, #tpu.memory_space<vmem>>, vector<1x128x128xbf16>
    %64 = vector.shape_cast %63 : vector<1x128x128xbf16> to vector<128x128xbf16>
    %cst_44 = arith.constant dense<0.000000e+00> : vector<16x128xf32>
    %65 = tpu.matmul %62, %64, %cst_44 {dimension_numbers = #tpu.dot_dimension_numbers<[1], [0], [0], [1], [0, 0, 1, 1], [], []>} : vector<16x128xbf16>, vector<128x128xbf16>, vector<16x128xf32> -> vector<16x128xf32>
    %c5_45 = arith.constant 5 : index
    %c0_46 = arith.constant 0 : index
    %66 = vector.load %arg3[%c5_45, %c0_46] : memref<8x128xf32, #tpu.memory_space<vmem>>, vector<1x128xf32>
    %67 = vector.broadcast %66 : vector<1x128xf32> to vector<16x128xf32>
    %68 = arith.addf %65, %67 : vector<16x128xf32>
    %69 = tpu.iota {dimensions = array<i32: 1>} : vector<16x128xi32>
    %c4_i32 = arith.constant 4 : i32
    %70 = vector.broadcast %c4_i32 : i32 to vector<16x128xi32>
    %71 = arith.cmpi slt, %69, %70 : vector<16x128xi32>
    %cst_47 = arith.constant -1.000000e+30 : f32
    %72 = vector.broadcast %cst_47 : f32 to vector<16x128xf32>
    %73 = arith.select %71, %68, %72 : vector<16x128xi1>, vector<16x128xf32>
    %cst_48 = arith.constant dense<0xFF800000> : vector<16xf32>
    %74 = vector.multi_reduction <maximumf>, %73, %cst_48 [1] : vector<16x128xf32> to vector<16xf32>
    %75 = vector.shape_cast %74 : vector<16xf32> to vector<16x1xf32>
    %76 = vector.broadcast %75 : vector<16x1xf32> to vector<16x128xf32>
    %77 = arith.subf %73, %76 : vector<16x128xf32>
    %78 = math.exp %77 : vector<16x128xf32>
    %cst_49 = arith.constant dense<0.000000e+00> : vector<16xf32>
    %79 = vector.multi_reduction <add>, %78, %cst_49 [1] : vector<16x128xf32> to vector<16xf32>
    %80 = vector.shape_cast %79 : vector<16xf32> to vector<16x1xf32>
    %81 = math.log %80 : vector<16x1xf32>
    %82 = vector.broadcast %81 : vector<16x1xf32> to vector<16x128xf32>
    %83 = arith.subf %77, %82 : vector<16x128xf32>
    %c0_50 = arith.constant 0 : index
    %c0_51 = arith.constant 0 : index
    %c0_52 = arith.constant 0 : index
    %84 = vector.load %arg4[%c0_50, %c0_51, %c0_52] : memref<1x16x128xf32, #tpu.memory_space<vmem>>, vector<1x16x128xf32>
    %85 = vector.shape_cast %84 : vector<1x16x128xf32> to vector<16x128xf32>
    %86 = vector.shape_cast %83 : vector<16x128xf32> to vector<1x16x128xf32>
    tpu.vector_store %arg4[%c0_50, %c0_51, %c0_52], %86 {strides = array<i32>} : memref<1x16x128xf32, #tpu.memory_space<vmem>>, vector<1x16x128xf32>,
    return
  }
  func.func @transform_0(%arg0: i32) -> (i32, i32, i32) {
    %c0_i32 = arith.constant 0 : i32
    %c0_i32_0 = arith.constant 0 : i32
    %c0_i32_1 = arith.constant 0 : i32
    return %arg0, %c0_i32, %c0_i32_0 : i32, i32, i32
  }
  func.func @transform_1(%arg0: i32) -> (i32, i32, i32) {
    %c0_i32 = arith.constant 0 : i32
    %c0_i32_0 = arith.constant 0 : i32
    %c0_i32_1 = arith.constant 0 : i32
    %c0_i32_2 = arith.constant 0 : i32
    return %c0_i32, %c0_i32_0, %c0_i32_1 : i32, i32, i32
  }
  func.func @transform_2(%arg0: i32) -> (i32, i32) {
    %c0_i32 = arith.constant 0 : i32
    %c0_i32_0 = arith.constant 0 : i32
    %c0_i32_1 = arith.constant 0 : i32
    return %c0_i32, %c0_i32_0 : i32, i32
  }
  func.func @transform_3(%arg0: i32) -> (i32, i32, i32) {
    %c0_i32 = arith.constant 0 : i32
    %c0_i32_0 = arith.constant 0 : i32
    %c0_i32_1 = arith.constant 0 : i32
    return %arg0, %c0_i32, %c0_i32_0 : i32, i32, i32
  }
}

</mosaic_0001>

<bundles_post_ra>
// kernel: gcn_forward.1
= control target key start
LH: loop header
LB: loop body
LE: loop exit
PB: predicated region body
PF: predicated region fallthrough
CT: control target
= control target key end

     0   :  { %s2844_s12 = smov 0   ;;  %s3126_s0 = inlined_call_operand.vmem [shape: bf16[4,272,128], index: 0, kind: input, shape index: {}]   ;;  %s3127_s1 = inlined_call_operand.vmem [shape: bf16[6,128,128], index: 1, kind: input, shape index: {}]   ;;  %s3128_s2 = inlined_call_operand.vmem [shape: f32[8,128], index: 2, kind: input, shape index: {}]   ;;  %s3129_s3 = inlined_call_operand.vmem [shape: f32[4,16,128], index: 3, kind: output, shape index: {}]  }
   0x1 LB: > { %s2022_s13 = sadd.s32 4294967295, %s2820_s12   ;;  %p2026_p0 = scmp.ge.s32.totalorder %s2820_s12, 1  ;;  %s2820_s12 = sphi %s2844_s12, %s13_s12  }
   0x2   : > { %p137_p1 = scmp.lt.s32.totalorder %s2820_s12, 5 }
   0x4   : > { %p138_p2 = pnand %p2026_p0, %p137_p1 }
   0x5   : > { %p161_p3 = scmp.lt.s32.totalorder (!%p138_p2), %s2022_s13, 3  ;;  %v2749_v0 = vld [vmem:[%s3127_s1] sm:$0xff] (!%p138_p2)   ;;  %v2750_v1 = vld [vmem:[%s3127_s1 + $0x8] sm:$0xff] (!%p138_p2)   ;;  %v2751_v2 = vld [vmem:[%s3127_s1 + $0x10] sm:$0xff] (!%p138_p2)   ;;  %vm2823_vm0 = vmmov (!%p138_p2), 0  }
   0x6   : > { %141 = sbr.rel (%p138_p2) target bundleno = 3154 (0xc52), region = 32  ;;  %2394 = vmatprep.subr.bf16.mxu1 (!%p138_p2), %v2749_v0  ;;  %v2752_v3 = vld [vmem:[%s3127_s1 + $0x18] sm:$0xff] (!%p138_p2)   ;;  %v2753_v7 = vld [vmem:[%s3127_s1 + $0x20] sm:$0xff] (!%p138_p2)   ;;  %v2754_v10 = vld [vmem:[%s3127_s1 + $0x28] sm:$0xff] (!%p138_p2)  }
   0x7   : > { %2395 = vmatpush3.bf16.msra.mxu1 (!%p138_p2), %v2749_v0  ;;  %v2755_v12 = vld [vmem:[%s3127_s1 + $0x30] sm:$0xff] (!%p138_p2)   ;;  %v2756_v23 = vld [vmem:[%s3127_s1 + $0x38] sm:$0xff] (!%p138_p2)   ;;  %v2757_v24 = vld [vmem:[%s3127_s1 + $0x40] sm:$0xff] (!%p138_p2)  }
   0x8   : > { %2396 = vmatprep.subr.bf16.mxu1 (!%p138_p2), %v2750_v1  ;;  %v2758_v25 = vld [vmem:[%s3127_s1 + $0x48] sm:$0xff] (!%p138_p2)   ;;  %v2759_v26 = vld [vmem:[%s3127_s1 + $0x50] sm:$0xff] (!%p138_p2)   ;;  %v2760_v27 = vld [vmem:[%s3127_s1 + $0x58] sm:$0xff] (!%p138_p2)  }
   0x9   : > { %v2761_v28 = vld [vmem:[%s3127_s1 + $0x60] sm:$0xff] (!%p138_p2)   ;;  %v2762_v29 = vld [vmem:[%s3127_s1 + $0x68] sm:$0xff] (!%p138_p2)   ;;  %v2763_v54 = vld [vmem:[%s3127_s1 + $0x70] sm:$0xff] (!%p138_p2)  }
   0xa   : > { %v2764_v55 = vld [vmem:[%s3127_s1 + $0x78] sm:$0xff] (!%p138_p2)   ;;  %v2046_v56 = vld [vmem:[%s3128_s2] ss:$0 sm:$0xff] (!%p138_p2) }
   0xb   : > { %2397 = vmatpush3.bf16.msra.mxu1 (!%p138_p2), %v2750_v1 }
   0xc   : > { %2398 = vmatprep.subr.bf16.mxu1 (!%p138_p2), %v2751_v2 }
   0xd   : > { %s3131_s13 = smov (!%p161_p3, %s2022_s13), 3 }
   0xe   : > { %s2722_s18 = smul.u32 136, %s3131_s13 }
   0xf   : > { %2399 = vmatpush3.bf16.msra.mxu1 %v2751_v2 }
  0x10   : > { %s2867_s23 = scalar_lea.vmem %s3126_s0, %s2722_s18  ;;  %2400 = vmatprep.subr.bf16.mxu1 %v2752_v3 }
  0x11   : > { %v2733_v4 = vld [vmem:[%s2867_s23 + $0x40] sm:$0xff]   ;;  %v2734_v5 = vld [vmem:[%s2867_s23 + $0x48] sm:$0xff]   ;;  %v2735_v6 = vld [vmem:[%s2867_s23 + $0x50] sm:$0xff]  }
  0x12   : > { %2362 = vmatprep.subr.bf16.mxu0 %v2733_v4  ;;  %v2736_v8 = vld [vmem:[%s2867_s23 + $0x58] sm:$0xff]   ;;  %v2880_v9 = vld [vmem:[%s2867_s23] sm:$0xff]   ;;  %v2738_v13 = vld [vmem:[%s2867_s23 + $0x68] sm:$0xff]  }
  0x13   : > { %2363 = vmatpush3.bf16.msra.mxu0 %v2733_v4  ;;  %2401 = vmatpush3.bf16.msra.mxu1 %v2752_v3  ;;  %v2737_v11 = vld [vmem:[%s2867_s23 + $0x60] sm:$0xff]   ;;  %v2739_v14 = vld [vmem:[%s2867_s23 + $0x70] sm:$0xff]   ;;  %v2740_v15 = vld [vmem:[%s2867_s23 + $0x78] sm:$0xff]  }
  0x14   : > { %2364 = vmatprep.subr.bf16.mxu0 %v2734_v5  ;;  %2402 = vmatprep.subr.bf16.mxu1 %v2753_v7  ;;  %v2894_v16 = vld [vmem:[%s2867_s23 + $0x8] sm:$0xff]   ;;  %v2897_v17 = vld [vmem:[%s2867_s23 + $0x10] sm:$0xff]   ;;  %v2902_v18 = vld [vmem:[%s2867_s23 + $0x18] sm:$0xff]  }
  0x15   : > { %2378 = vmatprep.mubr.bf16.mxu0 %v2880_v9  ;;  %v2905_v19 = vld [vmem:[%s2867_s23 + $0x20] sm:$0xff]   ;;  %v2910_v20 = vld [vmem:[%s2867_s23 + $0x28] sm:$0xff]   ;;  %v2913_v21 = vld [vmem:[%s2867_s23 + $0x30] sm:$0xff]  }
  0x16   : > { %v2918_v22 = vld [vmem:[%s2867_s23 + $0x38] sm:$0xff]  }
  0x17   : > { %2365 = vmatpush3.bf16.msra.mxu0 %v2734_v5  ;;  %2403 = vmatpush3.bf16.msra.mxu1 %v2753_v7 }
  0x18   : > { %2366 = vmatprep.subr.bf16.mxu0 %v2735_v6  ;;  %2404 = vmatprep.subr.bf16.mxu1 %v2754_v10 }
  0x1b   : > { %2367 = vmatpush3.bf16.msra.mxu0 %v2735_v6  ;;  %2405 = vmatpush3.bf16.msra.mxu1 %v2754_v10 }
  0x1c   : > { %2368 = vmatprep.subr.bf16.mxu0 %v2736_v8  ;;  %2406 = vmatprep.subr.bf16.mxu1 %v2755_v12 }
  0x1f   : > { %2369 = vmatpush3.bf16.msra.mxu0 %v2736_v8  ;;  %2407 = vmatpush3.bf16.msra.mxu1 %v2755_v12 }
  0x20   : > { %2370 = vmatprep.subr.bf16.mxu0 %v2737_v11  ;;  %2408 = vmatprep.subr.bf16.mxu1 %v2756_v23 }
  0x23   : > { %2371 = vmatpush3.bf16.msra.mxu0 %v2737_v11  ;;  %2409 = vmatpush3.bf16.msra.mxu1 %v2756_v23 }
  0x24   : > { %2372 = vmatprep.subr.bf16.mxu0 %v2738_v13 }
  0x27   : > { %2373 = vmatpush3.bf16.msra.mxu0 %v2738_v13 }
  0x28   : > { %2374 = vmatprep.subr.bf16.mxu0 %v2739_v14 }
  0x2b   : > { %2375 = vmatpush3.bf16.msra.mxu0 %v2739_v14 }
  0x2c   : > { %2376 = vmatprep.subr.bf16.mxu0 %v2740_v15 }
  0x2f   : > { %2377 = vmatpush3.bf16.msra.mxu0 %v2740_v15 }
  0x30   : > { %2426 = vmatprep.subr.bf16.mxu0 %v2757_v24 }
  0x32   : > { %2379 = vmatmul.mubr.bf16.vlgmr.msra.gmra.mrb[0].mxu0 %v2894_v16 }
  0x33   : > { %2382 = vmatprep.mubr.bf16.mxu0 %v2897_v17  ;;  %2427 = vmatpush3.bf16.msra.mxu0 %v2757_v24 }
  0x34   : > { %2428 = vmatprep.subr.bf16.mxu0 %v2758_v25 }
  0x37   : > { %2429 = vmatpush3.bf16.msra.mxu0 %v2758_v25 }
  0x38   : > { %2430 = vmatprep.subr.bf16.mxu0 %v2759_v26 }
  0x3a   : > { %2383 = vmatmul.mubr.bf16.gmra.mrb[4].mxu0 %v2902_v18 }
  0x3b   : > { %2386 = vmatprep.mubr.bf16.mxu0 %v2905_v19  ;;  %2431 = vmatpush3.bf16.msra.mxu0 %v2759_v26 }
  0x3c   : > { %2432 = vmatprep.subr.bf16.mxu0 %v2760_v27 }
  0x3f   : > { %2433 = vmatpush3.bf16.msra.mxu0 %v2760_v27 }
  0x40   : > { %2434 = vmatprep.subr.bf16.mxu0 %v2761_v28 }
  0x42   : > { %2387 = vmatmul.mubr.bf16.gmra.mrb[8].mxu0 %v2910_v20 }
  0x43   : > { %2390 = vmatprep.mubr.bf16.mxu0 %v2913_v21  ;;  %2435 = vmatpush3.bf16.msra.mxu0 %v2761_v28 }
  0x44   : > { %2436 = vmatprep.subr.bf16.mxu0 %v2762_v29 }
  0x47   : > { %2437 = vmatpush3.bf16.msra.mxu0 %v2762_v29 }
  0x48   : > { %2438 = vmatprep.subr.bf16.mxu0 %v2763_v54 }
  0x4a   : > { %2391 = vmatmul.mubr.bf16.gmra.mrb[12].mxu0 %v2918_v22 }
  0x4b   : > { %2439 = vmatpush3.bf16.msra.mxu0 %v2763_v54 }
  0x4c   : > { %2440 = vmatprep.subr.bf16.mxu0 %v2764_v55 }
  0x4f   : > { %2441 = vmatpush3.bf16.msra.mxu0 %v2764_v55 }
 0x105   : > { %v2380_v30 = vpop.f32.mrb[0].mxu0 }
 0x106   : > { %v336_v31 = vpop.f32.mrb[1].mxu0 }
 0x107   : > { %v2381_v32 = vpop.f32.mrb[2].mxu0 }
 0x108   : > { %v400_v33 = vpack.c.bf16 %v2381_v32, %v2380_v30  ;;  %v339_v34 = vpop.f32.mrb[3].mxu0 }
 0x109   : > { %v399_v35 = vpack.c.bf16 %v339_v34, %v336_v31 }
 0x10b   : > { %2410 = vmatprep.mubr.bf16.mxu1 %v399_v35 }
 0x10c   : > { %2411 = vmatmul.mubr.bf16.vlgmr.msra.gmra.mrb[0].mxu1 %v400_v33 }
 0x10d   : > { %v2384_v36 = vpop.f32.mrb[4].mxu0 }
 0x10e   : > { %v352_v37 = vpop.f32.mrb[5].mxu0 }
 0x10f   : > { %v2385_v38 = vpop.f32.mrb[6].mxu0 }
 0x110   : > { %v402_v39 = vpack.c.bf16 %v2385_v38, %v2384_v36  ;;  %v355_v40 = vpop.f32.mrb[7].mxu0 }
 0x111   : > { %v401_v41 = vpack.c.bf16 %v355_v40, %v352_v37 }
 0x113   : > { %2414 = vmatprep.mubr.bf16.mxu1 %v401_v41 }
 0x114   : > { %2415 = vmatmul.mubr.bf16.gmra.mrb[4].mxu1 %v402_v39 }
 0x115   : > { %v2388_v42 = vpop.f32.mrb[8].mxu0 }
 0x116   : > { %v368_v43 = vpop.f32.mrb[9].mxu0 }
 0x117   : > { %v2389_v44 = vpop.f32.mrb[10].mxu0 }
 0x118   : > { %v404_v45 = vpack.c.bf16 %v2389_v44, %v2388_v42  ;;  %v371_v46 = vpop.f32.mrb[11].mxu0 }
 0x119   : > { %v403_v47 = vpack.c.bf16 %v371_v46, %v368_v43 }
 0x11b   : > { %2418 = vmatprep.mubr.bf16.mxu1 %v403_v47 }
 0x11c   : > { %2419 = vmatmul.mubr.bf16.gmra.mrb[8].mxu1 %v404_v45 }
 0x11d   : > { %v2392_v48 = vpop.f32.mrb[12].mxu0 }
 0x11e   : > { %v384_v49 = vpop.f32.mrb[13].mxu0 }
 0x11f   : > { %v2393_v50 = vpop.f32.mrb[14].mxu0 }
 0x120   : > { %v406_v51 = vpack.c.bf16 %v2393_v50, %v2392_v48  ;;  %v387_v52 = vpop.f32.mrb[15].mxu0 }
 0x121   : > { %v405_v53 = vpack.c.bf16 %v387_v52, %v384_v49 }
 0x123   : > { %2422 = vmatprep.mubr.bf16.mxu1 %v405_v53 }
 0x124   : > { %2423 = vmatmul.mubr.bf16.gmra.mrb[12].mxu1 %v406_v51 }
 0x125   : > { %2474 = vmatprep.mubr.bf16.mxu1 %v2880_v9 }
 0x1df   : > { %v2412_v57 = vpop.f32.mrb[0].mxu1 }
 0x1e0   : > { %v519_v58 = vadd.f32 %v2412_v57, %v2046_v56  ;;  %v510_v59 = vpop.f32.mrb[1].mxu1 }
 0x1e1   : > { %v511_v60 = vadd.f32 %v2046_v56, %v510_v59  ;;  %v2413_v61 = vpop.f32.mrb[2].mxu1  ;;  %v2766_v59 = vld [vmem:[%s3127_s1 + $0x88] sm:$0xff]  }
 0x1e2   : > { %v522_v62 = vadd.f32 %v2413_v61, %v2046_v56  ;;  %v513_v63 = vpop.f32.mrb[3].mxu1  ;;  %v575_v1 = vmax.f32 %v519_v58, 0.0  ;;  %v2765_v58 = vld [vmem:[%s3127_s1 + $0x80] sm:$0xff]  }
 0x1e3   : > { %v514_v0 = vadd.f32 %v2046_v56, %v513_v63  ;;  %v573_v3 = vmax.f32 %v511_v60, 0.0  ;;  %2490 = vmatprep.subr.bf16.mxu0 %v2765_v58  ;;  %v2768_v60 = vld [vmem:[%s3127_s1 + $0x98] sm:$0xff]   ;;  %v2769_v61 = vld [vmem:[%s3127_s1 + $0xa0] sm:$0xff]  }
 0x1e4   : > { %v576_v2 = vmax.f32 %v522_v62, 0.0  ;;  %v2770_v62 = vld [vmem:[%s3127_s1 + $0xa8] sm:$0xff]  }
 0x1e5   : > { %v574_v4 = vmax.f32 %v514_v0, 0.0 }
 0x1e6   : > { %v590_v5 = vpack.c.bf16 %v576_v2, %v575_v1 }
 0x1e7   : > { %v589_v6 = vpack.c.bf16 %v574_v4, %v573_v3  ;;  %v2416_v7 = vpop.f32.mrb[4].mxu1 }
 0x1e8   : > { %v535_v8 = vadd.f32 %v2416_v7, %v2046_v56  ;;  %v526_v10 = vpop.f32.mrb[5].mxu1 }
 0x1e9   : > { %v527_v11 = vadd.f32 %v2046_v56, %v526_v10  ;;  %v2417_v12 = vpop.f32.mrb[6].mxu1  ;;  %2442 = vmatprep.mubr.bf16.mxu0 %v589_v6 }
 0x1ea   : > { %v538_v13 = vadd.f32 %v2417_v12, %v2046_v56  ;;  %v529_v14 = vpop.f32.mrb[7].mxu1  ;;  %2443 = vmatmul.mubr.bf16.vlgmr.msra.gmra.mrb[16].mxu0 %v590_v5  ;;  %v579_v23 = vmax.f32 %v535_v8, 0.0 }
 0x1eb   : > { %v530_v15 = vadd.f32 %v2046_v56, %v529_v14  ;;  %v577_v25 = vmax.f32 %v527_v11, 0.0  ;;  %2491 = vmatpush3.bf16.msra.mxu0 %v2765_v58 }
 0x1ec   : > { %v580_v24 = vmax.f32 %v538_v13, 0.0  ;;  %2492 = vmatprep.subr.bf16.mxu0 %v2766_v59 }
 0x1ed   : > { %v578_v26 = vmax.f32 %v530_v15, 0.0 }
 0x1ee   : > { %v592_v27 = vpack.c.bf16 %v580_v24, %v579_v23 }
 0x1ef   : > { %v591_v28 = vpack.c.bf16 %v578_v26, %v577_v25  ;;  %v2420_v29 = vpop.f32.mrb[8].mxu1  ;;  %2493 = vmatpush3.bf16.msra.mxu0 %v2766_v59 }
 0x1f0   : > { %v551_v30 = vadd.f32 %v2420_v29, %v2046_v56  ;;  %v542_v31 = vpop.f32.mrb[9].mxu1 }
 0x1f1   : > { %v543_v32 = vadd.f32 %v2046_v56, %v542_v31  ;;  %v2421_v33 = vpop.f32.mrb[10].mxu1  ;;  %2446 = vmatprep.mubr.bf16.mxu0 %v591_v28  ;;  %v2771_v31 = vld [vmem:[%s3127_s1 + $0xb0] sm:$0xff]  }
 0x1f2   : > { %v554_v34 = vadd.f32 %v2421_v33, %v2046_v56  ;;  %v545_v35 = vpop.f32.mrb[11].mxu1  ;;  %2447 = vmatmul.mubr.bf16.gmra.mrb[20].mxu0 %v592_v27  ;;  %v583_v37 = vmax.f32 %v551_v30, 0.0  ;;  %v2079_v33 = vld [vmem:[%s3128_s2 + $0x1] ss:$0 sm:$0xff] }
 0x1f3   : > { %v546_v36 = vadd.f32 %v2046_v56, %v545_v35  ;;  %v581_v39 = vmax.f32 %v543_v32, 0.0  ;;  %v2772_v32 = vld [vmem:[%s3127_s1 + $0xb8] sm:$0xff]  }
 0x1f4   : > { %v584_v38 = vmax.f32 %v554_v34, 0.0 }
 0x1f5   : > { %v582_v40 = vmax.f32 %v546_v36, 0.0 }
 0x1f6   : > { %v594_v41 = vpack.c.bf16 %v584_v38, %v583_v37 }
 0x1f7   : > { %v593_v42 = vpack.c.bf16 %v582_v40, %v581_v39  ;;  %v2424_v43 = vpop.f32.mrb[12].mxu1 }
 0x1f8   : > { %v567_v44 = vadd.f32 %v2424_v43, %v2046_v56  ;;  %v558_v45 = vpop.f32.mrb[13].mxu1 }
 0x1f9   : > { %v559_v46 = vadd.f32 %v2046_v56, %v558_v45  ;;  %v2425_v47 = vpop.f32.mrb[14].mxu1  ;;  %2450 = vmatprep.mubr.bf16.mxu0 %v593_v42 }
 0x1fa   : > { %v570_v48 = vadd.f32 %v2425_v47, %v2046_v56  ;;  %v561_v49 = vpop.f32.mrb[15].mxu1  ;;  %2451 = vmatmul.mubr.bf16.gmra.mrb[24].mxu0 %v594_v41  ;;  %v587_v51 = vmax.f32 %v567_v44, 0.0 }
 0x1fb   : > { %v562_v50 = vadd.f32 %v2046_v56, %v561_v49  ;;  %v585_v53 = vmax.f32 %v559_v46, 0.0  ;;  %v2767_v56 = vld [vmem:[%s3127_s1 + $0x90] sm:$0xff]  }
 0x1fc   : > { %v588_v52 = vmax.f32 %v570_v48, 0.0  ;;  %2494 = vmatprep.subr.bf16.mxu0 %v2767_v56 }
 0x1fd   : > { %v586_v54 = vmax.f32 %v562_v50, 0.0  ;;  %2495 = vmatpush3.bf16.msra.mxu0 %v2767_v56 }
 0x1fe   : > { %v596_v55 = vpack.c.bf16 %v588_v52, %v587_v51  ;;  %2496 = vmatprep.subr.bf16.mxu0 %v2768_v60 }
 0x1ff   : > { %v595_v57 = vpack.c.bf16 %v586_v54, %v585_v53 }
 0x201   : > { %2454 = vmatprep.mubr.bf16.mxu0 %v595_v57  ;;  %2497 = vmatpush3.bf16.msra.mxu0 %v2768_v60 }
 0x202   : > { %2455 = vmatmul.mubr.bf16.gmra.mrb[28].mxu0 %v596_v55  ;;  %2498 = vmatprep.subr.bf16.mxu0 %v2769_v61 }
 0x205   : > { %2499 = vmatpush3.bf16.msra.mxu0 %v2769_v61 }
 0x206   : > { %2500 = vmatprep.subr.bf16.mxu0 %v2770_v62 }
 0x209   : > { %2501 = vmatpush3.bf16.msra.mxu0 %v2770_v62 }
 0x20a   : > { %2502 = vmatprep.subr.bf16.mxu0 %v2771_v31 }
 0x20d   : > { %2503 = vmatpush3.bf16.msra.mxu0 %v2771_v31 }
 0x20e   : > { %2504 = vmatprep.subr.bf16.mxu0 %v2772_v32 }
 0x211   : > { %2505 = vmatpush3.bf16.msra.mxu0 %v2772_v32 }
 0x2bd   : > { %v2444_v63 = vpop.f32.mrb[16].mxu0 }
 0x2be   : > { %v696_v0 = vpop.f32.mrb[17].mxu0 }
 0x2bf   : > { %v2445_v1 = vpop.f32.mrb[18].mxu0 }
 0x2c0   : > { %v760_v2 = vpack.c.bf16 %v2445_v1, %v2444_v63  ;;  %v699_v3 = vpop.f32.mrb[19].mxu0 }
 0x2c1   : > { %v759_v4 = vpack.c.bf16 %v699_v3, %v696_v0 }
 0x2c3   : > { %2458 = vmatprep.subr.bf16.mxu1 %v759_v4 }
 0x2c4   : > { %2459 = vmatpush3.bf16.msra.mxu1 %v759_v4 }
 0x2c5   : > { %v2448_v5 = vpop.f32.mrb[20].mxu0  ;;  %2460 = vmatprep.subr.bf16.mxu1 %v760_v2 }
 0x2c6   : > { %v712_v6 = vpop.f32.mrb[21].mxu0 }
 0x2c7   : > { %v2449_v7 = vpop.f32.mrb[22].mxu0 }
 0x2c8   : > { %v762_v8 = vpack.c.bf16 %v2449_v7, %v2448_v5  ;;  %v715_v10 = vpop.f32.mrb[23].mxu0  ;;  %2461 = vmatpush3.bf16.msra.mxu1 %v760_v2 }
 0x2c9   : > { %v761_v11 = vpack.c.bf16 %v715_v10, %v712_v6 }
 0x2cb   : > { %2462 = vmatprep.subr.bf16.mxu1 %v761_v11 }
 0x2cc   : > { %2463 = vmatpush3.bf16.msra.mxu1 %v761_v11 }
 0x2cd   : > { %v2452_v12 = vpop.f32.mrb[24].mxu0  ;;  %2464 = vmatprep.subr.bf16.mxu1 %v762_v8 }
 0x2ce   : > { %v728_v13 = vpop.f32.mrb[25].mxu0 }
 0x2cf   : > { %v2453_v14 = vpop.f32.mrb[26].mxu0 }
 0x2d0   : > { %v764_v15 = vpack.c.bf16 %v2453_v14, %v2452_v12  ;;  %v731_v23 = vpop.f32.mrb[27].mxu0  ;;  %2465 = vmatpush3.bf16.msra.mxu1 %v762_v8 }
 0x2d1   : > { %v763_v24 = vpack.c.bf16 %v731_v23, %v728_v13 }
 0x2d3   : > { %2466 = vmatprep.subr.bf16.mxu1 %v763_v24 }
 0x2d4   : > { %2467 = vmatpush3.bf16.msra.mxu1 %v763_v24 }
 0x2d5   : > { %v2456_v25 = vpop.f32.mrb[28].mxu0  ;;  %2468 = vmatprep.subr.bf16.mxu1 %v764_v15 }
 0x2d6   : > { %v744_v26 = vpop.f32.mrb[29].mxu0 }
 0x2d7   : > { %v2457_v27 = vpop.f32.mrb[30].mxu0 }
 0x2d8   : > { %v766_v28 = vpack.c.bf16 %v2457_v27, %v2456_v25  ;;  %v747_v29 = vpop.f32.mrb[31].mxu0  ;;  %2469 = vmatpush3.bf16.msra.mxu1 %v764_v15 }
 0x2d9   : > { %v765_v30 = vpack.c.bf16 %v747_v29, %v744_v26 }
 0x2db   : > { %2470 = vmatprep.subr.bf16.mxu1 %v765_v30 }
 0x2dc   : > { %2471 = vmatpush3.bf16.msra.mxu1 %v765_v30 }
 0x2dd   : > { %2472 = vmatprep.subr.bf16.mxu1 %v766_v28 }
 0x2e0   : > { %2473 = vmatpush3.bf16.msra.mxu1 %v766_v28 }
 0x2e3   : > { %2475 = vmatmul.mubr.bf16.vlgmr.msra.gmra.mrb[16].mxu1 %v2894_v16 }
 0x2e4   : > { %2478 = vmatprep.mubr.bf16.mxu1 %v2897_v17 }
 0x2eb   : > { %2479 = vmatmul.mubr.bf16.gmra.mrb[20].mxu1 %v2902_v18 }
 0x2ec   : > { %2482 = vmatprep.mubr.bf16.mxu1 %v2905_v19 }
 0x2f3   : > { %2483 = vmatmul.mubr.bf16.gmra.mrb[24].mxu1 %v2910_v20 }
 0x2f4   : > { %2486 = vmatprep.mubr.bf16.mxu1 %v2913_v21 }
 0x2fb   : > { %2487 = vmatmul.mubr.bf16.gmra.mrb[28].mxu1 %v2918_v22 }
 0x2fc   : > { %2538 = vmatprep.mubr.bf16.mxu1 %v2880_v9 }
 0x3b6   : > { %v2476_v34 = vpop.f32.mrb[16].mxu1 }
 0x3b7   : > { %v815_v35 = vadd.f32 %v2476_v34, %v2079_v33  ;;  %v806_v36 = vpop.f32.mrb[17].mxu1 }
 0x3b8   : > { %v807_v37 = vadd.f32 %v2079_v33, %v806_v36  ;;  %v2477_v38 = vpop.f32.mrb[18].mxu1  ;;  %v2774_v36 = vld [vmem:[%s3127_s1 + $0xc8] sm:$0xff]  }
 0x3b9   : > { %v818_v39 = vadd.f32 %v2477_v38, %v2079_v33  ;;  %v809_v40 = vpop.f32.mrb[19].mxu1  ;;  %v871_v42 = vmax.f32 %v815_v35, 0.0  ;;  %v2773_v35 = vld [vmem:[%s3127_s1 + $0xc0] sm:$0xff]  }
 0x3ba   : > { %v810_v41 = vadd.f32 %v2079_v33, %v809_v40  ;;  %v869_v44 = vmax.f32 %v807_v37, 0.0  ;;  %2554 = vmatprep.subr.bf16.mxu0 %v2773_v35  ;;  %v2776_v37 = vld [vmem:[%s3127_s1 + $0xd8] sm:$0xff]   ;;  %v2777_v38 = vld [vmem:[%s3127_s1 + $0xe0] sm:$0xff]  }
 0x3bb   : > { %v872_v43 = vmax.f32 %v818_v39, 0.0  ;;  %v2778_v39 = vld [vmem:[%s3127_s1 + $0xe8] sm:$0xff]  }
 0x3bc   : > { %v870_v45 = vmax.f32 %v810_v41, 0.0 }
 0x3bd   : > { %v886_v46 = vpack.c.bf16 %v872_v43, %v871_v42 }
 0x3be   : > { %v885_v47 = vpack.c.bf16 %v870_v45, %v869_v44  ;;  %v2480_v48 = vpop.f32.mrb[20].mxu1 }
 0x3bf   : > { %v831_v49 = vadd.f32 %v2480_v48, %v2079_v33  ;;  %v822_v50 = vpop.f32.mrb[21].mxu1 }
 0x3c0   : > { %v823_v51 = vadd.f32 %v2079_v33, %v822_v50  ;;  %v2481_v52 = vpop.f32.mrb[22].mxu1  ;;  %2506 = vmatprep.mubr.bf16.mxu0 %v885_v47 }
 0x3c1   : > { %v834_v53 = vadd.f32 %v2481_v52, %v2079_v33  ;;  %v825_v54 = vpop.f32.mrb[23].mxu1  ;;  %2507 = vmatmul.mubr.bf16.vlgmr.msra.gmra.mrb[32].mxu0 %v886_v46  ;;  %v875_v57 = vmax.f32 %v831_v49, 0.0 }
 0x3c2   : > { %v826_v55 = vadd.f32 %v2079_v33, %v825_v54  ;;  %v873_v59 = vmax.f32 %v823_v51, 0.0  ;;  %2555 = vmatpush3.bf16.msra.mxu0 %v2773_v35 }
 0x3c3   : > { %v876_v58 = vmax.f32 %v834_v53, 0.0  ;;  %2556 = vmatprep.subr.bf16.mxu0 %v2774_v36 }
 0x3c4   : > { %v874_v56 = vmax.f32 %v826_v55, 0.0 }
 0x3c5   : > { %v888_v60 = vpack.c.bf16 %v876_v58, %v875_v57 }
 0x3c6   : > { %v887_v61 = vpack.c.bf16 %v874_v56, %v873_v59  ;;  %v2484_v62 = vpop.f32.mrb[24].mxu1  ;;  %2557 = vmatpush3.bf16.msra.mxu0 %v2774_v36 }
 0x3c7   : > { %v847_v63 = vadd.f32 %v2484_v62, %v2079_v33  ;;  %v838_v0 = vpop.f32.mrb[25].mxu1 }
 0x3c8   : > { %v839_v1 = vadd.f32 %v2079_v33, %v838_v0  ;;  %v2485_v2 = vpop.f32.mrb[26].mxu1  ;;  %2510 = vmatprep.mubr.bf16.mxu0 %v887_v61  ;;  %v2779_v0 = vld [vmem:[%s3127_s1 + $0xf0] sm:$0xff]  }
 0x3c9   : > { %v850_v3 = vadd.f32 %v2485_v2, %v2079_v33  ;;  %v841_v4 = vpop.f32.mrb[27].mxu1  ;;  %2511 = vmatmul.mubr.bf16.gmra.mrb[36].mxu0 %v888_v60  ;;  %v879_v6 = vmax.f32 %v847_v63, 0.0 }
 0x3ca   : > { %v842_v5 = vadd.f32 %v2079_v33, %v841_v4  ;;  %v877_v8 = vmax.f32 %v839_v1, 0.0 }
 0x3cb   : > { %v880_v7 = vmax.f32 %v850_v3, 0.0 }
 0x3cc   : > { %v878_v10 = vmax.f32 %v842_v5, 0.0 }
 0x3cd   : > { %v890_v11 = vpack.c.bf16 %v880_v7, %v879_v6 }
 0x3ce   : > { %v889_v12 = vpack.c.bf16 %v878_v10, %v877_v8  ;;  %v2488_v13 = vpop.f32.mrb[28].mxu1 }
 0x3cf   : > { %v863_v14 = vadd.f32 %v2488_v13, %v2079_v33  ;;  %v854_v15 = vpop.f32.mrb[29].mxu1 }
 0x3d0   : > { %v855_v23 = vadd.f32 %v2079_v33, %v854_v15  ;;  %v2489_v24 = vpop.f32.mrb[30].mxu1  ;;  %2514 = vmatprep.mubr.bf16.mxu0 %v889_v12 }
 0x3d1   : > { %v866_v25 = vadd.f32 %v2489_v24, %v2079_v33  ;;  %v857_v26 = vpop.f32.mrb[31].mxu1  ;;  %2515 = vmatmul.mubr.bf16.gmra.mrb[40].mxu0 %v890_v11  ;;  %v883_v28 = vmax.f32 %v863_v14, 0.0 }
 0x3d2   : > { %v858_v27 = vadd.f32 %v2079_v33, %v857_v26  ;;  %v881_v30 = vmax.f32 %v855_v23, 0.0  ;;  %v2775_v33 = vld [vmem:[%s3127_s1 + $0xd0] sm:$0xff]  }
 0x3d3   : > { %v884_v29 = vmax.f32 %v866_v25, 0.0  ;;  %2558 = vmatprep.subr.bf16.mxu0 %v2775_v33 }
 0x3d4   : > { %v882_v31 = vmax.f32 %v858_v27, 0.0  ;;  %2559 = vmatpush3.bf16.msra.mxu0 %v2775_v33 }
 0x3d5   : > { %v892_v32 = vpack.c.bf16 %v884_v29, %v883_v28  ;;  %2560 = vmatprep.subr.bf16.mxu0 %v2776_v37 }
 0x3d6   : > { %v891_v34 = vpack.c.bf16 %v882_v31, %v881_v30 }
 0x3d8   : > { %2518 = vmatprep.mubr.bf16.mxu0 %v891_v34  ;;  %2561 = vmatpush3.bf16.msra.mxu0 %v2776_v37 }
 0x3d9   : > { %2519 = vmatmul.mubr.bf16.gmra.mrb[44].mxu0 %v892_v32  ;;  %2562 = vmatprep.subr.bf16.mxu0 %v2777_v38 }
 0x3dc   : > { %2563 = vmatpush3.bf16.msra.mxu0 %v2777_v38 }
 0x3dd   : > { %2564 = vmatprep.subr.bf16.mxu0 %v2778_v39 }
 0x3e0   : > { %2565 = vmatpush3.bf16.msra.mxu0 %v2778_v39 }
 0x3e1   : > { %2566 = vmatprep.subr.bf16.mxu0 %v2779_v0 }
 0x3e4   : > { %2567 = vmatpush3.bf16.msra.mxu0 %v2779_v0  ;;  %v2781_v0 = vld [vmem:[%s3127_s1 + $0x100] sm:$0xff]  }
 0x494   : > { %v2508_v40 = vpop.f32.mrb[32].mxu0 }
 0x495   : > { %v992_v41 = vpop.f32.mrb[33].mxu0 }
 0x496   : > { %v2509_v42 = vpop.f32.mrb[34].mxu0 }
 0x497   : > { %v1056_v43 = vpack.c.bf16 %v2509_v42, %v2508_v40  ;;  %v995_v44 = vpop.f32.mrb[35].mxu0 }
 0x498   : > { %v1055_v45 = vpack.c.bf16 %v995_v44, %v992_v41 }
 0x49a   : > { %2522 = vmatprep.subr.bf16.mxu1 %v1055_v45 }
 0x49b   : > { %2523 = vmatpush3.bf16.msra.mxu1 %v1055_v45 }
 0x49c   : > { %v2512_v46 = vpop.f32.mrb[36].mxu0  ;;  %2524 = vmatprep.subr.bf16.mxu1 %v1056_v43 }
 0x49d   : > { %v1008_v47 = vpop.f32.mrb[37].mxu0 }
 0x49e   : > { %v2513_v48 = vpop.f32.mrb[38].mxu0 }
 0x49f   : > { %v1058_v49 = vpack.c.bf16 %v2513_v48, %v2512_v46  ;;  %v1011_v50 = vpop.f32.mrb[39].mxu0  ;;  %2525 = vmatpush3.bf16.msra.mxu1 %v1056_v43 }
 0x4a0   : > { %v1057_v51 = vpack.c.bf16 %v1011_v50, %v1008_v47 }
 0x4a2   : > { %2526 = vmatprep.subr.bf16.mxu1 %v1057_v51 }
 0x4a3   : > { %2527 = vmatpush3.bf16.msra.mxu1 %v1057_v51 }
 0x4a4   : > { %v2516_v52 = vpop.f32.mrb[40].mxu0  ;;  %2528 = vmatprep.subr.bf16.mxu1 %v1058_v49 }
 0x4a5   : > { %v1024_v53 = vpop.f32.mrb[41].mxu0 }
 0x4a6   : > { %v2517_v54 = vpop.f32.mrb[42].mxu0 }
 0x4a7   : > { %v1060_v55 = vpack.c.bf16 %v2517_v54, %v2516_v52  ;;  %v1027_v57 = vpop.f32.mrb[43].mxu0  ;;  %2529 = vmatpush3.bf16.msra.mxu1 %v1058_v49 }
 0x4a8   : > { %v1059_v58 = vpack.c.bf16 %v1027_v57, %v1024_v53 }
 0x4aa   : > { %2530 = vmatprep.subr.bf16.mxu1 %v1059_v58 }
 0x4ab   : > { %2531 = vmatpush3.bf16.msra.mxu1 %v1059_v58 }
 0x4ac   : > { %v2520_v59 = vpop.f32.mrb[44].mxu0  ;;  %2532 = vmatprep.subr.bf16.mxu1 %v1060_v55 }
 0x4ad   : > { %v1040_v56 = vpop.f32.mrb[45].mxu0 }
 0x4ae   : > { %v2521_v60 = vpop.f32.mrb[46].mxu0 }
 0x4af   : > { %v1062_v61 = vpack.c.bf16 %v2521_v60, %v2520_v59  ;;  %v1043_v62 = vpop.f32.mrb[47].mxu0  ;;  %2533 = vmatpush3.bf16.msra.mxu1 %v1060_v55 }
 0x4b0   : > { %v1061_v63 = vpack.c.bf16 %v1043_v62, %v1040_v56 }
 0x4b2   : > { %2534 = vmatprep.subr.bf16.mxu1 %v1061_v63 }
 0x4b3   : > { %2535 = vmatpush3.bf16.msra.mxu1 %v1061_v63 }
 0x4b4   : > { %2536 = vmatprep.subr.bf16.mxu1 %v1062_v61 }
 0x4b7   : > { %2537 = vmatpush3.bf16.msra.mxu1 %v1062_v61 }
 0x4ba   : > { %2539 = vmatmul.mubr.bf16.vlgmr.msra.gmra.mrb[32].mxu1 %v2894_v16  ;;  %v2780_v16 = vld [vmem:[%s3127_s1 + $0xf8] sm:$0xff]  }
 0x4bb   : > { %2542 = vmatprep.mubr.bf16.mxu1 %v2897_v17  ;;  %2568 = vmatprep.subr.bf16.mxu0 %v2780_v16  ;;  %v2104_v17 = vld [vmem:[%s3128_s2 + $0x2] ss:$0 sm:$0xff] }
 0x4bc   : > { %2569 = vmatpush3.bf16.msra.mxu0 %v2780_v16  ;;  %v2782_v16 = vld [vmem:[%s3127_s1 + $0x108] sm:$0xff]  }
 0x4bd   : > { %2618 = vmatprep.subr.bf16.mxu0 %v2781_v0 }
 0x4c2   : > { %2543 = vmatmul.mubr.bf16.gmra.mrb[36].mxu1 %v2902_v18 }
 0x4c3   : > { %2546 = vmatprep.mubr.bf16.mxu1 %v2905_v19 }
 0x4ca   : > { %2547 = vmatmul.mubr.bf16.gmra.mrb[40].mxu1 %v2910_v20 }
 0x4cb   : > { %2550 = vmatprep.mubr.bf16.mxu1 %v2913_v21 }
 0x4d2   : > { %2551 = vmatmul.mubr.bf16.gmra.mrb[44].mxu1 %v2918_v22 }
 0x4d3   : > { %2602 = vmatprep.mubr.bf16.mxu1 %v2880_v9 }
 0x58d   : > { %v2540_v1 = vpop.f32.mrb[32].mxu1 }
 0x58e   : > { %v1111_v2 = vadd.f32 %v2540_v1, %v2104_v17  ;;  %v1102_v3 = vpop.f32.mrb[33].mxu1  ;;  %v2784_v1 = vld [vmem:[%s3127_s1 + $0x118] sm:$0xff]  }
 0x58f   : > { %v1103_v9 = vadd.f32 %v2104_v17, %v1102_v3  ;;  %v2541_v4 = vpop.f32.mrb[34].mxu1  ;;  %v2786_v3 = vld [vmem:[%s3127_s1 + $0x128] sm:$0xff]  }
 0x590   : > { %v1114_v5 = vadd.f32 %v2541_v4, %v2104_v17  ;;  %v1105_v6 = vpop.f32.mrb[35].mxu1  ;;  %v1167_v8 = vmax.f32 %v1111_v2, 0.0  ;;  %v2785_v2 = vld [vmem:[%s3127_s1 + $0x120] sm:$0xff]  }
 0x591   : > { %v1106_v7 = vadd.f32 %v2104_v17, %v1105_v6  ;;  %v1165_v11 = vmax.f32 %v1103_v9, 0.0 }
 0x592   : > { %v1168_v10 = vmax.f32 %v1114_v5, 0.0 }
 0x593   : > { %v1166_v12 = vmax.f32 %v1106_v7, 0.0 }
 0x594   : > { %v1182_v13 = vpack.c.bf16 %v1168_v10, %v1167_v8 }
 0x595   : > { %v1181_v14 = vpack.c.bf16 %v1166_v12, %v1165_v11  ;;  %v2544_v15 = vpop.f32.mrb[36].mxu1 }
 0x596   : > { %v1127_v23 = vadd.f32 %v2544_v15, %v2104_v17  ;;  %v1118_v24 = vpop.f32.mrb[37].mxu1 }
 0x597   : > { %v1119_v25 = vadd.f32 %v2104_v17, %v1118_v24  ;;  %v2545_v26 = vpop.f32.mrb[38].mxu1  ;;  %2570 = vmatprep.mubr.bf16.mxu0 %v1181_v14 }
 0x598   : > { %v1130_v27 = vadd.f32 %v2545_v26, %v2104_v17  ;;  %v1121_v28 = vpop.f32.mrb[39].mxu1  ;;  %2571 = vmatmul.mubr.bf16.vlgmr.msra.gmra.mrb[48].mxu0 %v1182_v13  ;;  %v1171_v30 = vmax.f32 %v1127_v23, 0.0 }
 0x599   : > { %v1122_v29 = vadd.f32 %v2104_v17, %v1121_v28  ;;  %v1169_v32 = vmax.f32 %v1119_v25, 0.0  ;;  %2619 = vmatpush3.bf16.msra.mxu0 %v2781_v0 }
 0x59a   : > { %v1172_v31 = vmax.f32 %v1130_v27, 0.0  ;;  %2620 = vmatprep.subr.bf16.mxu0 %v2782_v16 }
 0x59b   : > { %v1170_v34 = vmax.f32 %v1122_v29, 0.0 }
 0x59c   : > { %v1184_v35 = vpack.c.bf16 %v1172_v31, %v1171_v30 }
 0x59d   : > { %v1183_v36 = vpack.c.bf16 %v1170_v34, %v1169_v32  ;;  %v2548_v33 = vpop.f32.mrb[40].mxu1  ;;  %2621 = vmatpush3.bf16.msra.mxu0 %v2782_v16 }
 0x59e   : > { %v1143_v37 = vadd.f32 %v2548_v33, %v2104_v17  ;;  %v1134_v38 = vpop.f32.mrb[41].mxu1  ;;  %v3045_v33 = vld [vmem:[%s2867_s23 + $0x10] sm:$0xff]  }
 0x59f   : > { %v1135_v39 = vadd.f32 %v2104_v17, %v1134_v38  ;;  %v2549_v40 = vpop.f32.mrb[42].mxu1  ;;  %2574 = vmatprep.mubr.bf16.mxu0 %v1183_v36  ;;  %v3041_v36 = vld [vmem:[%s2867_s23 + $0x8] sm:$0xff]   ;;  %v2787_v38 = vld [vmem:[%s3127_s1 + $0x130] sm:$0xff]  }
 0x5a0   : > { %v1146_v41 = vadd.f32 %v2549_v40, %v2104_v17  ;;  %v1137_v42 = vpop.f32.mrb[43].mxu1  ;;  %2575 = vmatmul.mubr.bf16.gmra.mrb[52].mxu0 %v1184_v35  ;;  %v1175_v44 = vmax.f32 %v1143_v37, 0.0  ;;  %v2808_v37 = vld [vmem:[%s2867_s23] sm:$0xff]  }
 0x5a1   : > { %v1138_v43 = vadd.f32 %v2104_v17, %v1137_v42  ;;  %v1173_v46 = vmax.f32 %v1135_v39, 0.0 }
 0x5a2   : > { %v1176_v45 = vmax.f32 %v1146_v41, 0.0 }
 0x5a3   : > { %v1174_v47 = vmax.f32 %v1138_v43, 0.0 }
 0x5a4   : > { %v1186_v48 = vpack.c.bf16 %v1176_v45, %v1175_v44 }
 0x5a5   : > { %v1185_v49 = vpack.c.bf16 %v1174_v47, %v1173_v46  ;;  %v2552_v50 = vpop.f32.mrb[44].mxu1 }
 0x5a6   : > { %v1159_v51 = vadd.f32 %v2552_v50, %v2104_v17  ;;  %v1150_v52 = vpop.f32.mrb[45].mxu1 }
 0x5a7   : > { %v1151_v53 = vadd.f32 %v2104_v17, %v1150_v52  ;;  %v2553_v54 = vpop.f32.mrb[46].mxu1  ;;  %2578 = vmatprep.mubr.bf16.mxu0 %v1185_v49 }
 0x5a8   : > { %v1162_v55 = vadd.f32 %v2553_v54, %v2104_v17  ;;  %v1153_v57 = vpop.f32.mrb[47].mxu1  ;;  %2579 = vmatmul.mubr.bf16.gmra.mrb[56].mxu0 %v1186_v48  ;;  %v1179_v59 = vmax.f32 %v1159_v51, 0.0 }
 0x5a9   : > { %v1154_v58 = vadd.f32 %v2104_v17, %v1153_v57  ;;  %v1177_v60 = vmax.f32 %v1151_v53, 0.0  ;;  %v2783_v17 = vld [vmem:[%s3127_s1 + $0x110] sm:$0xff]  }
 0x5aa   : > { %v1180_v56 = vmax.f32 %v1162_v55, 0.0  ;;  %2622 = vmatprep.subr.bf16.mxu0 %v2783_v17 }
 0x5ab   : > { %v1178_v61 = vmax.f32 %v1154_v58, 0.0  ;;  %2623 = vmatpush3.bf16.msra.mxu0 %v2783_v17 }
 0x5ac   : > { %v1188_v62 = vpack.c.bf16 %v1180_v56, %v1179_v59  ;;  %2624 = vmatprep.subr.bf16.mxu0 %v2784_v1 }
 0x5ad   : > { %v1187_v63 = vpack.c.bf16 %v1178_v61, %v1177_v60 }
 0x5af   : > { %2582 = vmatprep.mubr.bf16.mxu0 %v1187_v63  ;;  %2625 = vmatpush3.bf16.msra.mxu0 %v2784_v1 }
 0x5b0   : > { %2583 = vmatmul.mubr.bf16.gmra.mrb[60].mxu0 %v1188_v62  ;;  %2626 = vmatprep.subr.bf16.mxu0 %v2785_v2 }
 0x5b3   : > { %2627 = vmatpush3.bf16.msra.mxu0 %v2785_v2 }
 0x5b4   : > { %2628 = vmatprep.subr.bf16.mxu0 %v2786_v3 }
 0x5b7   : > { %2629 = vmatpush3.bf16.msra.mxu0 %v2786_v3 }
 0x5b8   : > { %2630 = vmatprep.subr.bf16.mxu0 %v2787_v38 }
 0x5bb   : > { %2631 = vmatpush3.bf16.msra.mxu0 %v2787_v38 }
 0x66b   : > { %v2572_v9 = vpop.f32.mrb[48].mxu0 }
 0x66c   : > { %v1288_v4 = vpop.f32.mrb[49].mxu0 }
 0x66d   : > { %v2573_v5 = vpop.f32.mrb[50].mxu0 }
 0x66e   : > { %v1352_v6 = vpack.c.bf16 %v2573_v5, %v2572_v9  ;;  %v1291_v7 = vpop.f32.mrb[51].mxu0 }
 0x66f   : > { %v1351_v8 = vpack.c.bf16 %v1291_v7, %v1288_v4 }
 0x671   : > { %2586 = vmatprep.subr.bf16.mxu1 %v1351_v8 }
 0x672   : > { %2587 = vmatpush3.bf16.msra.mxu1 %v1351_v8 }
 0x673   : > { %v2576_v10 = vpop.f32.mrb[52].mxu0  ;;  %2588 = vmatprep.subr.bf16.mxu1 %v1352_v6 }
 0x674   : > { %v1304_v11 = vpop.f32.mrb[53].mxu0 }
 0x675   : > { %v2577_v12 = vpop.f32.mrb[54].mxu0 }
 0x676   : > { %v1354_v13 = vpack.c.bf16 %v2577_v12, %v2576_v10  ;;  %v1307_v14 = vpop.f32.mrb[55].mxu0  ;;  %2589 = vmatpush3.bf16.msra.mxu1 %v1352_v6 }
 0x677   : > { %v1353_v15 = vpack.c.bf16 %v1307_v14, %v1304_v11 }
 0x679   : > { %2590 = vmatprep.subr.bf16.mxu1 %v1353_v15 }
 0x67a   : > { %2591 = vmatpush3.bf16.msra.mxu1 %v1353_v15 }
 0x67b   : > { %v2580_v23 = vpop.f32.mrb[56].mxu0  ;;  %2592 = vmatprep.subr.bf16.mxu1 %v1354_v13 }
 0x67c   : > { %v1320_v24 = vpop.f32.mrb[57].mxu0 }
 0x67d   : > { %v2581_v25 = vpop.f32.mrb[58].mxu0 }
 0x67e   : > { %v1356_v26 = vpack.c.bf16 %v2581_v25, %v2580_v23  ;;  %v1323_v27 = vpop.f32.mrb[59].mxu0  ;;  %2593 = vmatpush3.bf16.msra.mxu1 %v1354_v13 }
 0x67f   : > { %v1355_v28 = vpack.c.bf16 %v1323_v27, %v1320_v24 }
 0x681   : > { %2594 = vmatprep.subr.bf16.mxu1 %v1355_v28 }
 0x682   : > { %2595 = vmatpush3.bf16.msra.mxu1 %v1355_v28 }
 0x683   : > { %v2584_v29 = vpop.f32.mrb[60].mxu0  ;;  %2596 = vmatprep.subr.bf16.mxu1 %v1356_v26 }
 0x684   : > { %v1336_v30 = vpop.f32.mrb[61].mxu0 }
 0x685   : > { %v2585_v31 = vpop.f32.mrb[62].mxu0 }
 0x686   : > { %v1358_v32 = vpack.c.bf16 %v2585_v31, %v2584_v29  ;;  %v1339_v34 = vpop.f32.mrb[63].mxu0  ;;  %2597 = vmatpush3.bf16.msra.mxu1 %v1356_v26 }
 0x687   : > { %v1357_v35 = vpack.c.bf16 %v1339_v34, %v1336_v30 }
 0x689   : > { %2598 = vmatprep.subr.bf16.mxu1 %v1357_v35 }
 0x68a   : > { %2599 = vmatpush3.bf16.msra.mxu1 %v1357_v35 }
 0x68b   : > { %2600 = vmatprep.subr.bf16.mxu1 %v1358_v32 }
 0x68e   : > { %2601 = vmatpush3.bf16.msra.mxu1 %v1358_v32 }
 0x691   : > { %2603 = vmatmul.mubr.bf16.vlgmr.msra.gmra.mrb[48].mxu1 %v3041_v36 }
 0x692   : > { %2606 = vmatprep.mubr.bf16.mxu1 %v3045_v33 }
 0x699   : > { %2607 = vmatmul.mubr.bf16.gmra.mrb[52].mxu1 %v2902_v18  ;;  %v2788_v18 = vld [vmem:[%s3127_s1 + $0x138] sm:$0xff]  }
 0x69a   : > { %2610 = vmatprep.mubr.bf16.mxu1 %v2905_v19  ;;  %2632 = vmatprep.subr.bf16.mxu0 %v2788_v18  ;;  %v2129_v19 = vld [vmem:[%s3128_s2 + $0x3] ss:$0 sm:$0xff] }
 0x69b   : > { %2633 = vmatpush3.bf16.msra.mxu0 %v2788_v18 }
 0x6a1   : > { %2611 = vmatmul.mubr.bf16.gmra.mrb[56].mxu1 %v2910_v20 }
 0x6a2   : > { %2614 = vmatprep.mubr.bf16.mxu1 %v2913_v21 }
 0x6a9   : > { %2615 = vmatmul.mubr.bf16.gmra.mrb[60].mxu1 %v2918_v22 }
 0x6aa   : > { %2666 = vmatprep.mubr.bf16.mxu1 %v2808_v37 }
 0x764   : > { %v2604_v20 = vpop.f32.mrb[48].mxu1 }
 0x765   : > { %v1407_v21 = vadd.f32 %v2604_v20, %v2129_v19  ;;  %v1398_v22 = vpop.f32.mrb[49].mxu1 }
 0x766   : > { %v1399_v39 = vadd.f32 %v2129_v19, %v1398_v22  ;;  %v2605_v40 = vpop.f32.mrb[50].mxu1 }
 0x767   : > { %v1410_v41 = vadd.f32 %v2605_v40, %v2129_v19  ;;  %v1401_v42 = vpop.f32.mrb[51].mxu1  ;;  %v1463_v44 = vmax.f32 %v1407_v21, 0.0 }
 0x768   : > { %v1402_v43 = vadd.f32 %v2129_v19, %v1401_v42  ;;  %v1461_v46 = vmax.f32 %v1399_v39, 0.0 }
 0x769   : > { %v1464_v45 = vmax.f32 %v1410_v41, 0.0 }
 0x76a   : > { %v1462_v47 = vmax.f32 %v1402_v43, 0.0 }
 0x76b   : > { %v1478_v48 = vpack.c.bf16 %v1464_v45, %v1463_v44 }
 0x76c   : > { %v1477_v49 = vpack.c.bf16 %v1462_v47, %v1461_v46  ;;  %v2608_v50 = vpop.f32.mrb[52].mxu1 }
 0x76d   : > { %v1423_v51 = vadd.f32 %v2608_v50, %v2129_v19  ;;  %v1414_v52 = vpop.f32.mrb[53].mxu1 }
 0x76e   : > { %v1415_v53 = vadd.f32 %v2129_v19, %v1414_v52  ;;  %v2609_v54 = vpop.f32.mrb[54].mxu1  ;;  %2634 = vmatprep.mubr.bf16.mxu0 %v1477_v49 }
 0x76f   : > { %v1426_v55 = vadd.f32 %v2609_v54, %v2129_v19  ;;  %v1417_v57 = vpop.f32.mrb[55].mxu1  ;;  %2635 = vmatmul.mubr.bf16.vlgmr.msra.gmra.mrb[64].mxu0 %v1478_v48  ;;  %v1467_v59 = vmax.f32 %v1423_v51, 0.0  ;;  %v2809_v54 = vld [vmem:[%s2867_s23 + $0x18] sm:$0xff]  }
 0x770   : > { %v1418_v58 = vadd.f32 %v2129_v19, %v1417_v57  ;;  %v1465_v60 = vmax.f32 %v1415_v53, 0.0  ;;  %v2811_v57 = vld [vmem:[%s2867_s23 + $0x28] sm:$0xff]  }
 0x771   : > { %v1468_v56 = vmax.f32 %v1426_v55, 0.0  ;;  %v2810_v55 = vld [vmem:[%s2867_s23 + $0x20] sm:$0xff]  }
 0x772   : > { %v1466_v61 = vmax.f32 %v1418_v58, 0.0  ;;  %v2812_v58 = vld [vmem:[%s2867_s23 + $0x30] sm:$0xff]  }
 0x773   : > { %v1480_v62 = vpack.c.bf16 %v1468_v56, %v1467_v59  ;;  %v2813_v59 = vld [vmem:[%s2867_s23 + $0x38] sm:$0xff]   ;;  %v2822_v56 = vmov 0.0  }
 0x774   : > { %v1479_v63 = vpack.c.bf16 %v1466_v61, %v1465_v60  ;;  %v2612_v0 = vpop.f32.mrb[56].mxu1  ;;  %2682 = vmatprep.subr.bf16.mxu0 %v2822_v56  ;;  %v2792_v60 = vld [vmem:[%s3127_s1 + $0x150] sm:$0xff]   ;;  %v2793_v61 = vld [vmem:[%s3127_s1 + $0x158] sm:$0xff]  }
 0x775   : > { %v1439_v16 = vadd.f32 %v2612_v0, %v2129_v19  ;;  %v1430_v17 = vpop.f32.mrb[57].mxu1  ;;  %v2796_v0 = vld [vmem:[%s3127_s1 + $0x170] sm:$0xff]  }
 0x776   : > { %v1431_v1 = vadd.f32 %v2129_v19, %v1430_v17  ;;  %v2613_v2 = vpop.f32.mrb[58].mxu1  ;;  %2638 = vmatprep.mubr.bf16.mxu0 %v1479_v63  ;;  %v2795_v63 = vld [vmem:[%s3127_s1 + $0x168] sm:$0xff]  }
 0x777   : > { %v1442_v3 = vadd.f32 %v2613_v2, %v2129_v19  ;;  %v1433_v9 = vpop.f32.mrb[59].mxu1  ;;  %2639 = vmatmul.mubr.bf16.gmra.mrb[68].mxu0 %v1480_v62  ;;  %v1471_v5 = vmax.f32 %v1439_v16, 0.0  ;;  %v2794_v62 = vld [vmem:[%s3127_s1 + $0x160] sm:$0xff]  }
 0x778   : > { %v1434_v4 = vadd.f32 %v2129_v19, %v1433_v9  ;;  %v1469_v7 = vmax.f32 %v1431_v1, 0.0  ;;  %v2154_v16 = vld [vmem:[%s3128_s2 + $0x4] ss:$0 sm:$0xff] }
 0x779   : > { %v1472_v6 = vmax.f32 %v1442_v3, 0.0 }
 0x77a   : > { %v1470_v8 = vmax.f32 %v1434_v4, 0.0 }
 0x77b   : > { %v1482_v10 = vpack.c.bf16 %v1472_v6, %v1471_v5 }
 0x77c   : > { %v1481_v11 = vpack.c.bf16 %v1470_v8, %v1469_v7  ;;  %v2616_v12 = vpop.f32.mrb[60].mxu1 }
 0x77d   : > { %v1455_v13 = vadd.f32 %v2616_v12, %v2129_v19  ;;  %v1446_v14 = vpop.f32.mrb[61].mxu1 }
 0x77e   : > { %v1447_v15 = vadd.f32 %v2129_v19, %v1446_v14  ;;  %v2617_v23 = vpop.f32.mrb[62].mxu1  ;;  %2642 = vmatprep.mubr.bf16.mxu0 %v1481_v11 }
 0x77f   : > { %v1458_v24 = vadd.f32 %v2617_v23, %v2129_v19  ;;  %v1449_v25 = vpop.f32.mrb[63].mxu1  ;;  %2643 = vmatmul.mubr.bf16.gmra.mrb[72].mxu0 %v1482_v10  ;;  %v1475_v27 = vmax.f32 %v1455_v13, 0.0 }
 0x780   : > { %v1450_v26 = vadd.f32 %v2129_v19, %v1449_v25  ;;  %v1473_v29 = vmax.f32 %v1447_v15, 0.0 }
 0x781   : > { %v1476_v28 = vmax.f32 %v1458_v24, 0.0 }
 0x782   : > { %v1474_v30 = vmax.f32 %v1450_v26, 0.0 }
 0x783   : > { %v1484_v31 = vpack.c.bf16 %v1476_v28, %v1475_v27 }
 0x784   : > { %v1483_v32 = vpack.c.bf16 %v1474_v30, %v1473_v29 }
 0x786   : > { %2646 = vmatprep.mubr.bf16.mxu0 %v1483_v32 }
 0x787   : > { %2647 = vmatmul.mubr.bf16.gmra.mrb[76].mxu0 %v1484_v31 }
 0x788   : > { %2698 = vmatprep.mubr.msk.bf16.mxu0 %vm2823_vm0, %v2822_v56 }
 0x842   : > { %v2636_v34 = vpop.f32.mrb[64].mxu0 }
 0x843   : > { %v1584_v35 = vpop.f32.mrb[65].mxu0 }
 0x844   : > { %v2637_v37 = vpop.f32.mrb[66].mxu0 }
 0x845   : > { %v1648_v38 = vpack.c.bf16 %v2637_v37, %v2636_v34  ;;  %v1587_v18 = vpop.f32.mrb[67].mxu0 }
 0x846   : > { %v1647_v20 = vpack.c.bf16 %v1587_v18, %v1584_v35 }
 0x848   : > { %2650 = vmatprep.subr.bf16.mxu1 %v1647_v20 }
 0x849   : > { %2651 = vmatpush3.bf16.msra.mxu1 %v1647_v20 }
 0x84a   : > { %v2640_v21 = vpop.f32.mrb[68].mxu0  ;;  %2652 = vmatprep.subr.bf16.mxu1 %v1648_v38 }
 0x84b   : > { %v1600_v22 = vpop.f32.mrb[69].mxu0 }
 0x84c   : > { %v2641_v19 = vpop.f32.mrb[70].mxu0 }
 0x84d   : > { %v1650_v39 = vpack.c.bf16 %v2641_v19, %v2640_v21  ;;  %v1603_v40 = vpop.f32.mrb[71].mxu0  ;;  %2653 = vmatpush3.bf16.msra.mxu1 %v1648_v38 }
 0x84e   : > { %v1649_v41 = vpack.c.bf16 %v1603_v40, %v1600_v22 }
 0x850   : > { %2654 = vmatprep.subr.bf16.mxu1 %v1649_v41 }
 0x851   : > { %2655 = vmatpush3.bf16.msra.mxu1 %v1649_v41 }
 0x852   : > { %v2644_v42 = vpop.f32.mrb[72].mxu0  ;;  %2656 = vmatprep.subr.bf16.mxu1 %v1650_v39 }
 0x853   : > { %v1616_v43 = vpop.f32.mrb[73].mxu0 }
 0x854   : > { %v2645_v44 = vpop.f32.mrb[74].mxu0 }
 0x855   : > { %v1652_v45 = vpack.c.bf16 %v2645_v44, %v2644_v42  ;;  %v1619_v46 = vpop.f32.mrb[75].mxu0  ;;  %2657 = vmatpush3.bf16.msra.mxu1 %v1650_v39 }
 0x856   : > { %v1651_v47 = vpack.c.bf16 %v1619_v46, %v1616_v43 }
 0x858   : > { %2658 = vmatprep.subr.bf16.mxu1 %v1651_v47 }
 0x859   : > { %2659 = vmatpush3.bf16.msra.mxu1 %v1651_v47 }
 0x85a   : > { %v2648_v48 = vpop.f32.mrb[76].mxu0  ;;  %2660 = vmatprep.subr.bf16.mxu1 %v1652_v45 }
 0x85b   : > { %v1632_v49 = vpop.f32.mrb[77].mxu0 }
 0x85c   : > { %v2649_v50 = vpop.f32.mrb[78].mxu0 }
 0x85d   : > { %v1654_v51 = vpack.c.bf16 %v2649_v50, %v2648_v48  ;;  %v1635_v52 = vpop.f32.mrb[79].mxu0  ;;  %2661 = vmatpush3.bf16.msra.mxu1 %v1652_v45 }
 0x85e   : > { %v1653_v53 = vpack.c.bf16 %v1635_v52, %v1632_v49 }
 0x860   : > { %2662 = vmatprep.subr.bf16.mxu1 %v1653_v53 }
 0x861   : > { %2663 = vmatpush3.bf16.msra.mxu1 %v1653_v53 }
 0x862   : > { %2664 = vmatprep.subr.bf16.mxu1 %v1654_v51 }
 0x865   : > { %2665 = vmatpush3.bf16.msra.mxu1 %v1654_v51 }
 0x866   : > { %2702 = vmatprep.subr.bf16.mxu1 %v2822_v56 }
 0x868   : > { %2667 = vmatmul.mubr.bf16.vlgmr.msra.gmra.mrb[64].mxu1 %v3041_v36  ;;  %v2790_v36 = vld [vmem:[%s3127_s1 + $0x140] sm:$0xff]  }
 0x869   : > { %2670 = vmatprep.mubr.bf16.mxu1 %v3045_v33  ;;  %2703 = vmatpush3.bf16.msra.mxu1 %v2790_v36  ;;  %v2791_v33 = vld [vmem:[%s3127_s1 + $0x148] sm:$0xff]  }
 0x86a   : > { %2704 = vmatprep.subr.bf16.mxu1 %v2822_v56 }
 0x86d   : > { %2705 = vmatpush3.bf16.msra.mxu1 %v2791_v33  ;;  %v2789_v33 = vld [vmem:[%s2867_s23 + $0x80] sm:$0xff]   ;;  %s2183_s23 = sshll.u32 %s3131_s13, 4 }
 0x86e   : > { %2706 = vmatprep.subr.bf16.mxu1 %v2822_v56  ;;  %s170_s5 = scalar_lea.vmem %s3129_s3, %s2183_s23 }
 0x870   : > { %2671 = vmatmul.mubr.bf16.gmra.mrb[68].mxu1 %v2809_v54 }
 0x871   : > { %2674 = vmatprep.mubr.bf16.mxu1 %v2810_v55  ;;  %2707 = vmatpush3.bf16.msra.mxu1 %v2792_v60  ;;  %v2797_v60 = vld [vmem:[%s3127_s1 + $0x178] sm:$0xff]  }
 0x872   : > { %2708 = vmatprep.subr.bf16.mxu1 %v2822_v56 }
 0x875   : > { %2709 = vmatpush3.bf16.msra.mxu1 %v2793_v61 }
 0x876   : > { %2710 = vmatprep.subr.bf16.mxu1 %v2822_v56 }
 0x878   : > { %2675 = vmatmul.mubr.bf16.gmra.mrb[72].mxu1 %v2811_v57 }
 0x879   : > { %2678 = vmatprep.mubr.bf16.mxu1 %v2812_v58  ;;  %2711 = vmatpush3.bf16.msra.mxu1 %v2794_v62 }
 0x87a   : > { %2712 = vmatprep.subr.bf16.mxu1 %v2822_v56 }
 0x87d   : > { %2713 = vmatpush3.bf16.msra.mxu1 %v2795_v63 }
 0x87e   : > { %2714 = vmatprep.subr.bf16.mxu1 %v2822_v56 }
 0x880   : > { %2679 = vmatmul.mubr.bf16.gmra.mrb[76].mxu1 %v2813_v59 }
 0x881   : > { %2718 = vmatprep.mubr.msk.bf16.mxu1 %vm2823_vm0, %v2822_v56  ;;  %2715 = vmatpush3.bf16.msra.mxu1 %v2796_v0 }
 0x882   : > { %2716 = vmatprep.subr.bf16.mxu1 %v2822_v56 }
 0x885   : > { %2717 = vmatpush3.bf16.msra.mxu1 %v2797_v60 }
 0x93b   : > { %v2668_v17 = vpop.f32.mrb[64].mxu1 }
 0x93c   : > { %v1703_v1 = vadd.f32 %v2668_v17, %v2154_v16  ;;  %v1694_v2 = vpop.f32.mrb[65].mxu1  ;;  %v1940_v17 = vlaneseq }
 0x93d   : > { %v1695_v3 = vadd.f32 %v2154_v16, %v1694_v2  ;;  %v2669_v9 = vpop.f32.mrb[66].mxu1 }
 0x93e   : > { %v1706_v4 = vadd.f32 %v2669_v9, %v2154_v16  ;;  %v1697_v5 = vpop.f32.mrb[67].mxu1  ;;  %v1759_v7 = vmax.f32 %v1703_v1, 0.0  ;;  %v1941_v1 = vand.u32 127, %v1940_v17 }
 0x93f   : > { %v1698_v6 = vadd.f32 %v2154_v16, %v1697_v5  ;;  %v1757_v10 = vmax.f32 %v1695_v3, 0.0 }
 0x940   : > { %v1760_v8 = vmax.f32 %v1706_v4, 0.0  ;;  %vm1942_vm1 = vcmp.lt.s32.totalorder %v1941_v1, 4 }
 0x941   : > { %v1758_v11 = vmax.f32 %v1698_v6, 0.0 }
 0x942   : > { %v1774_v12 = vpack.c.bf16 %v1760_v8, %v1759_v7 }
 0x943   : > { %v1773_v13 = vpack.c.bf16 %v1758_v11, %v1757_v10  ;;  %v2672_v14 = vpop.f32.mrb[68].mxu1 }
 0x944   : > { %v1719_v15 = vadd.f32 %v2672_v14, %v2154_v16  ;;  %v1710_v23 = vpop.f32.mrb[69].mxu1 }
 0x945   : > { %v1711_v24 = vadd.f32 %v2154_v16, %v1710_v23  ;;  %v2673_v25 = vpop.f32.mrb[70].mxu1  ;;  %2683 = vmatpush3.bf16.msra.mxu0 %v1773_v13 }
 0x946   : > { %v1722_v26 = vadd.f32 %v2673_v25, %v2154_v16  ;;  %v1713_v27 = vpop.f32.mrb[71].mxu1  ;;  %2684 = vmatprep.subr.bf16.mxu0 %v2822_v56  ;;  %v1763_v29 = vmax.f32 %v1719_v15, 0.0 }
 0x947   : > { %v1714_v28 = vadd.f32 %v2154_v16, %v1713_v27  ;;  %v1761_v31 = vmax.f32 %v1711_v24, 0.0 }
 0x948   : > { %v1764_v30 = vmax.f32 %v1722_v26, 0.0 }
 0x949   : > { %v1762_v32 = vmax.f32 %v1714_v28, 0.0  ;;  %2685 = vmatpush3.bf16.msra.mxu0 %v1774_v12 }
 0x94a   : > { %v1776_v34 = vpack.c.bf16 %v1764_v30, %v1763_v29  ;;  %2686 = vmatprep.subr.bf16.mxu0 %v2822_v56 }
 0x94b   : > { %v1775_v35 = vpack.c.bf16 %v1762_v32, %v1761_v31  ;;  %v2676_v37 = vpop.f32.mrb[72].mxu1 }
 0x94c   : > { %v1735_v38 = vadd.f32 %v2676_v37, %v2154_v16  ;;  %v1726_v18 = vpop.f32.mrb[73].mxu1 }
 0x94d   : > { %v1727_v20 = vadd.f32 %v2154_v16, %v1726_v18  ;;  %v2677_v21 = vpop.f32.mrb[74].mxu1  ;;  %2687 = vmatpush3.bf16.msra.mxu0 %v1775_v35 }
 0x94e   : > { %v1738_v22 = vadd.f32 %v2677_v21, %v2154_v16  ;;  %v1729_v19 = vpop.f32.mrb[75].mxu1  ;;  %2688 = vmatprep.subr.bf16.mxu0 %v2822_v56  ;;  %v1767_v40 = vmax.f32 %v1735_v38, 0.0 }
 0x94f   : > { %v1730_v39 = vadd.f32 %v2154_v16, %v1729_v19  ;;  %v1765_v42 = vmax.f32 %v1727_v20, 0.0 }
 0x950   : > { %v1768_v41 = vmax.f32 %v1738_v22, 0.0 }
 0x951   : > { %v1766_v43 = vmax.f32 %v1730_v39, 0.0  ;;  %2689 = vmatpush3.bf16.msra.mxu0 %v1776_v34 }
 0x952   : > { %v1778_v44 = vpack.c.bf16 %v1768_v41, %v1767_v40  ;;  %2690 = vmatprep.subr.bf16.mxu0 %v2822_v56 }
 0x953   : > { %v1777_v45 = vpack.c.bf16 %v1766_v43, %v1765_v42  ;;  %v2680_v46 = vpop.f32.mrb[76].mxu1 }
 0x954   : > { %v1751_v47 = vadd.f32 %v2680_v46, %v2154_v16  ;;  %v1742_v48 = vpop.f32.mrb[77].mxu1 }
 0x955   : > { %v1743_v49 = vadd.f32 %v2154_v16, %v1742_v48  ;;  %v2681_v50 = vpop.f32.mrb[78].mxu1  ;;  %2691 = vmatpush3.bf16.msra.mxu0 %v1777_v45 }
 0x956   : > { %v1754_v51 = vadd.f32 %v2681_v50, %v2154_v16  ;;  %v1745_v52 = vpop.f32.mrb[79].mxu1  ;;  %2692 = vmatprep.subr.bf16.mxu0 %v2822_v56  ;;  %v1771_v54 = vmax.f32 %v1751_v47, 0.0 }
 0x957   : > { %v1746_v53 = vadd.f32 %v2154_v16, %v1745_v52  ;;  %v1769_v57 = vmax.f32 %v1743_v49, 0.0 }
 0x958   : > { %v1772_v55 = vmax.f32 %v1754_v51, 0.0 }
 0x959   : > { %v1770_v58 = vmax.f32 %v1746_v53, 0.0  ;;  %2693 = vmatpush3.bf16.msra.mxu0 %v1778_v44 }
 0x95a   : > { %v1780_v59 = vpack.c.bf16 %v1772_v55, %v1771_v54  ;;  %2694 = vmatprep.subr.bf16.mxu0 %v2822_v56 }
 0x95b   : > { %v1779_v36 = vpack.c.bf16 %v1770_v58, %v1769_v57 }
 0x95d   : > { %2695 = vmatpush3.bf16.msra.mxu0 %v1779_v36 }
 0x95e   : > { %2696 = vmatprep.subr.bf16.mxu0 %v2822_v56  ;;  %v2172_v56 = vld [vmem:[%s3128_s2 + $0x5] ss:$0 sm:$0xff] }
 0x961   : > { %2697 = vmatpush3.bf16.msra.mxu0 %v1780_v59 }
 0x964   : > { %2699 = vmatmul.mubr.bf16.vlgmr.msra.gmra.mrb[80].mxu0 %v2789_v33 }
 0xa37   : > { %v1821_v61 = vpop.f32.mrb[80].mxu0 }
 0xa38   : > { %v2700_v62 = vpop.f32.mrb[81].mxu0 }
 0xa39   : > { %v1824_v63 = vpop.f32.mrb[82].mxu0 }
 0xa3a   : > { %v1828_v0 = vpack.c.bf16 %v1824_v63, %v1821_v61  ;;  %v2701_v16 = vpop.f32.mrb[83].mxu0 }
 0xa3c   : > { %2719 = vmatmul.mubr.bf16.vlgmr.msra.gmra.mrb[80].mxu1 %v1828_v0 }
 0xb0f   : > { %v1933_v2 = vpop.f32.mrb[80].mxu1 }
 0xb10   : > { %v1934_v3 = vadd.f32 %v2172_v56, %v1933_v2  ;;  %v2720_v9 = vpop.f32.mrb[81].mxu1 }
 0xb11   : > { %v1936_v4 = vpop.f32.mrb[82].mxu1 }
 0xb12   : > { %v1937_v5 = vadd.f32 %v2172_v56, %v1936_v4  ;;  %v2721_v6 = vpop.f32.mrb[83].mxu1  ;;  %v1943_v7 = vsel %vm1942_vm1, %v1934_v3, -1e+30 }
 0xb13   : > { %1945 = vmax.xlane.f32.xlu0 %v1943_v7 }
 0xb14   : > { %v1944_v8 = vsel %vm1942_vm1, %v1937_v5, -1e+30 }
 0xb17   : > { %1947 = vmax.xlane.f32.xlu0 %v1944_v8 }
 0xba0   : > { %v1946_v10 = vpop.xlane.xlu0 %1945 }
 0xba1   : > { %v1949_v11 = vsub.f32 %v1943_v7, %v1946_v10 }
 0xba3   : > { %v1951_v12 = vmul.f32 1.442695, %v1949_v11 }
 0xba4   : > { %v1948_v13 = vpop.xlane.xlu0 %1947 }
 0xba5   : > { %v1950_v14 = vsub.f32 %v1944_v8, %v1948_v13  ;;  %2798 = vpow2.f32 %v1951_v12 }
 0xba7   : > { %v1953_v15 = vmul.f32 1.442695, %v1950_v14 }
 0xba9   : > { %2800 = vpow2.f32 %v1953_v15 }
 0xbaf   : > { %v2799_v23 = vpop.eup %2798 }
 0xbb0   : > { %1955 = vadd.xlane.f32.xlu1 %v2799_v23 }
 0xbb3   : > { %v2801_v24 = vpop.eup %2800 }
 0xbb4   : > { %1957 = vadd.xlane.f32.xlu1 %v2801_v24 }
 0xc3d   : > { %v1956_v25 = vpop.xlane.xlu1 %1955 }
 0xc3e   : > { %2802 = vlog2.f32 %v1956_v25 }
 0xc41   : > { %v1958_v26 = vpop.xlane.xlu1 %1957 }
 0xc42   : > { %2804 = vlog2.f32 %v1958_v26 }
 0xc48   : > { %v2803_v27 = vpop.eup %2802 }
 0xc49   : > { %v1960_v28 = vmul.f32 0.6931472, %v2803_v27 }
 0xc4b   : > { %v1963_v29 = vsub.f32 %v1949_v11, %v1960_v28 }
 0xc4c   : > { %v2805_v30 = vpop.eup %2804 }
 0xc4d   : > { %1965 = vst [vmem:[%s170_s5] sm:$0xff] %v1963_v29  ;;  %v1962_v31 = vmul.f32 0.6931472, %v2805_v30 }
 0xc4f   : > { %v1964_v32 = vsub.f32 %v1950_v14, %v1962_v31 }
 0xc51   : > { %1966 = vst [vmem:[%s170_s5 + $0x8] sm:$0xff] %v1964_v32 }
 0xc52 PF: > { %s13_s12 = sadd.s32 1, %s2820_s12  }
 0xc53   : > { %p10_p4 = scmp.ge.s32.totalorder %s13_s12, 6  }
 0xc55   :  { %12 = sbr.rel (!%p10_p4) target bundleno = 1 (0x1), region = 67 }

</bundles_post_ra>
